<compile_context>
chip_gen: v5e
topology: v5e:2x2
jax: 0.10.0
libtpu: 0.0.40
codegen_flags: <defaults>
</compile_context>

<pallas_src>
import functools

import jax
import jax.numpy as jnp
import numpy as np
from jax.experimental import pallas as pl
from jax.experimental.pallas import tpu as pltpu

# ----------------------------- problem sizes --------------------------------
G = 8           # number of graphs batched into one pallas_call
N = 16          # number of messages (edges) per graph
INPUT = 16      # input feature size
HSIZE = 32      # hidden state size
MAX_NEI = 4     # max neighbors per message
DEPTH = 3       # message-passing steps


# ------------------------------- kernel -------------------------------------
def gru_mp_kernel(depth, max_nei,
                  fmess_ref, bgraph_ref, wx_ref, ur4_ref, wo_ref, b3_ref,
                  out_ref):
    n, hsz = out_ref.shape

    x = fmess_ref[...]                      # (N, INPUT)      f32
    bg = bgraph_ref[...]                    # (N, MAX_NEI)    i32
    wx = wx_ref[...]                        # (INPUT, 3H)     bf16: [W_r | W_z_x | W_h_x]
    ur4 = ur4_ref[...]                      # (4H, 4H)        bf16: blockdiag(U_r x4)
    wo = wo_ref[...]                        # (2H, 2H)        bf16: blockdiag(W_z_h, W_h_h)
    b3 = b3_ref[...]                        # (1, 3H)         f32:  [br | bz | bh]

    # Row-0 mask (the dummy message row stays zero).
    mask = (jax.lax.broadcasted_iota(jnp.int32, (n, 1), 0) != 0).astype(
        jnp.float32)

    # ---------------- depth-invariant per-graph work (hoisted) ---------------
    # One-hot gather matrices: onehots[m][i, j] = (bgraph[i, m] == j), so
    # onehots[m] @ h == h[bgraph[:, m]].  Kept in f32 so the gather is exact
    # and never rounds the recurrent state.
    col_iota = jax.lax.broadcasted_iota(jnp.int32, (n, n), 1)
    onehots = [(bg[:, m:m + 1] == col_iota).astype(jnp.float32)
               for m in range(max_nei)]

    # Fused x-projection (one matmul instead of 3), biases folded in once.
    xw = jnp.dot(x.astype(jnp.bfloat16), wx,
                 preferred_element_type=jnp.float32) + b3             # (N, 3H)
    r1b = xw[:, 0 * hsz:1 * hsz]            # W_r(x) + br
    zhx = xw[:, 1 * hsz:3 * hsz]            # [W_z_x(x) + bz | W_h_x(x) + bh]
    # r1 broadcast over the MAX_NEI lane groups, hoisted (lane-dense (16,128)).
    r1_dense = jnp.concatenate([r1b] * max_nei, axis=1)               # (N, 4H)

    # ---------------- depth recurrence (h lives in vregs) --------------------
    h = jnp.zeros((n, hsz), jnp.float32)
    for _ in range(depth):                  # static unroll over depth
        # Lane-dense neighbor gather: MAX_NEI independent (N,N)@(N,H) f32
        # matmuls concatenated along lanes -> (N, MAX_NEI*H) = (16, 128).
        h_nei = jnp.concatenate(
            [jnp.dot(oh, h, preferred_element_type=jnp.float32)
             for oh in onehots], axis=1)                              # (N, 4H)
        # r gate for all neighbors at once: one 128-wide MXU contraction.
        r2 = jnp.dot(h_nei.astype(jnp.bfloat16), ur4,
                     preferred_element_type=jnp.float32)              # (N, 4H)
        r = jax.nn.sigmoid(r1_dense + r2)                             # f32 EUP
        gated = r * h_nei                                             # f32 VPU
        # Neighbor reductions: lane-group slice-adds at 32-lane offsets.
        sum_h = h_nei[:, 0:hsz]
        sum_gated = gated[:, 0:hsz]
        for m in range(1, max_nei):
            sum_h = sum_h + h_nei[:, m * hsz:(m + 1) * hsz]
            sum_gated = sum_gated + gated[:, m * hsz:(m + 1) * hsz]
        # Fused z / pre_h projection: one (N, 2H) @ (2H, 2H) block-diag push.
        zh = jnp.dot(
            jnp.concatenate([sum_h, sum_gated], axis=1).astype(jnp.bfloat16),
            wo, preferred_element_type=jnp.float32)                   # (N, 2H)
        pre = zhx + zh
        z = jax.nn.sigmoid(pre[:, :hsz])
        pre_h = jnp.tanh(pre[:, hsz:])
        new_h = (1.0 - z) * sum_h + z * pre_h
        h = new_h * mask

    out_ref[...] = h        # single write; no scratch round-trip


# ------------------------------ wrapper --------------------------------------
@jax.jit
def gru_forward(fmess, bgraph, params):
    """fmess: (G, N, INPUT) f32, bgraph: (G, N, MAX_NEI) i32 -> (G, N, HSIZE)."""
    (wzx, wzh, bz, wr, ur, br, whx, whh, bh) = params
    g, n, input_size = fmess.shape
    hsz = wzh.shape[0]

    # Weight fusion done once on the XLA side (outside the kernel).
    w_x = jnp.concatenate([wr, wzx, whx], axis=1).astype(jnp.bfloat16)   # (IN, 3H)
    b3 = jnp.concatenate([br, bz, bh], axis=1)                           # (1, 3H) f32
    ur4 = jnp.kron(jnp.eye(MAX_NEI, dtype=jnp.float32),
                   ur).astype(jnp.bfloat16)                              # (4H, 4H)
    zeros = jnp.zeros((hsz, hsz), jnp.float32)
    w_o = jnp.concatenate(
        [jnp.concatenate([wzh, zeros], axis=1),
         jnp.concatenate([zeros, whh], axis=1)], axis=0).astype(jnp.bfloat16)

    kernel = functools.partial(gru_mp_kernel, DEPTH, MAX_NEI)

    def const_spec(arr):      # weights: resident in VMEM across the whole grid
        return pl.BlockSpec(arr.shape, lambda i: (0,) * arr.ndim)

    return pl.pallas_call(
        kernel,
        out_shape=jax.ShapeDtypeStruct((g, n, hsz), jnp.float32),
        grid=(g,),
        in_specs=[
            pl.BlockSpec((None, n, input_size), lambda i: (i, 0, 0)),   # fmess
            pl.BlockSpec((None, n, MAX_NEI), lambda i: (i, 0, 0)),      # bgraph
            const_spec(w_x),
            const_spec(ur4),
            const_spec(w_o),
            const_spec(b3),
        ],
        out_specs=pl.BlockSpec((None, n, hsz), lambda i: (i, 0, 0)),
        compiler_params=pltpu.CompilerParams(
            dimension_semantics=("parallel",)),
    )(fmess, bgraph, w_x, ur4, w_o, b3)


# --------------------------- pure-JAX references ------------------------------
def gru_forward_ref(fmess, bgraph, params):
    """Exact float32 reference of the PyTorch module forward (one graph)."""
    (wzx, wzh, bz, wr, ur, br, whx, whh, bh) = params
    n = fmess.shape[0]
    h = jnp.zeros((n, HSIZE), jnp.float32)
    mask = jnp.ones((n, 1), jnp.float32).at[0, 0].set(0.0)
    for _ in range(DEPTH):
        h_nei = h[bgraph]                                    # (N, MAX_NEI, H)
        sum_h = h_nei.sum(axis=1)
        z = jax.nn.sigmoid(fmess @ wzx + sum_h @ wzh + bz)
        r1 = (fmess @ wr)[:, None, :]
        r2 = h_nei @ ur + br
        r = jax.nn.sigmoid(r1 + r2)
        sum_gated = (r * h_nei).sum(axis=1)
        pre_h = jnp.tanh(fmess @ whx + sum_gated @ whh + bh)
        h = ((1.0 - z) * sum_h + z * pre_h) * mask
    return h


def gru_forward_mixed_ref(fmess, bgraph, params):
    """Reference mirroring the kernel's precision split (one graph):
    bf16 MXU operands / f32 accumulation for the projections, exact f32 gather
    and f32 gating math."""
    (wzx, wzh, bz, wr, ur, br, whx, whh, bh) = params
    bf, f32 = jnp.bfloat16, jnp.float32
    n = fmess.shape[0]
    x_bf = fmess.astype(bf)
    r1b = jnp.dot(x_bf, wr.astype(bf), preferred_element_type=f32) + br
    zxb = jnp.dot(x_bf, wzx.astype(bf), preferred_element_type=f32) + bz
    hxb = jnp.dot(x_bf, whx.astype(bf), preferred_element_type=f32) + bh
    h = jnp.zeros((n, HSIZE), f32)
    mask = jnp.ones((n, 1), f32).at[0, 0].set(0.0)
    for _ in range(DEPTH):
        h_nei = h[bgraph]                                    # exact f32 gather
        sum_h = h_nei.sum(axis=1)
        r2 = jnp.dot(h_nei.astype(bf), ur.astype(bf), preferred_element_type=f32)
        r = jax.nn.sigmoid(r1b[:, None, :] + r2)
        sum_gated = (r * h_nei).sum(axis=1)
        z = jax.nn.sigmoid(zxb + jnp.dot(sum_h.astype(bf), wzh.astype(bf),
                                         preferred_element_type=f32))
        pre_h = jnp.tanh(hxb + jnp.dot(sum_gated.astype(bf), whh.astype(bf),
                                       preferred_element_type=f32))
        h = ((1.0 - z) * sum_h + z * pre_h) * mask
    return h


# --------------------------------- main --------------------------------------
if __name__ == "__main__":
    key = jax.random.PRNGKey(0)
    keys = jax.random.split(key, 12)

    # Deterministic synthetic parameters (Linear weights stored as (in, out)).
    s_zin = 1.0 / np.sqrt(INPUT + HSIZE)
    s_in = 1.0 / np.sqrt(INPUT)
    s_h = 1.0 / np.sqrt(HSIZE)
    wzx = jax.random.uniform(keys[0], (INPUT, HSIZE), jnp.float32, -s_zin, s_zin)
    wzh = jax.random.uniform(keys[1], (HSIZE, HSIZE), jnp.float32, -s_zin, s_zin)
    bz = jax.random.uniform(keys[2], (1, HSIZE), jnp.float32, -s_zin, s_zin)
    wr = jax.random.uniform(keys[3], (INPUT, HSIZE), jnp.float32, -s_in, s_in)
    ur = jax.random.uniform(keys[4], (HSIZE, HSIZE), jnp.float32, -s_h, s_h)
    br = jax.random.uniform(keys[5], (1, HSIZE), jnp.float32, -s_h, s_h)
    whx = jax.random.uniform(keys[6], (INPUT, HSIZE), jnp.float32, -s_zin, s_zin)
    whh = jax.random.uniform(keys[7], (HSIZE, HSIZE), jnp.float32, -s_zin, s_zin)
    bh = jax.random.uniform(keys[8], (1, HSIZE), jnp.float32, -s_zin, s_zin)
    params = (wzx, wzh, bz, wr, ur, br, whx, whh, bh)

    # Inputs: a batch of G graphs (message features + bond graph index table).
    fmess = jax.random.normal(keys[9], (G, N, INPUT), jnp.float32)
    bgraph = jax.random.randint(keys[10], (G, N, MAX_NEI), 0, N, jnp.int32)

    out = jax.block_until_ready(gru_forward(fmess, bgraph, params))

    ref_mixed = jax.vmap(lambda f, b: gru_forward_mixed_ref(f, b, params))(
        fmess, bgraph)
    ref_f32 = jax.vmap(lambda f, b: gru_forward_ref(f, b, params))(
        fmess, bgraph)
    ref_mixed = jax.block_until_ready(ref_mixed)
    ref_f32 = jax.block_until_ready(ref_f32)

    # Tight check against the matching mixed-precision reference, loose sanity
    # check against the exact float32 module reference (bf16 MXU operands in
    # the projections introduce ~1e-2-level deviations from pure f32).
    np.testing.assert_allclose(np.asarray(out), np.asarray(ref_mixed),
                               rtol=2e-3, atol=2e-3)
    np.testing.assert_allclose(np.asarray(out), np.asarray(ref_f32),
                               rtol=1e-1, atol=1e-1)
    print("KERNEL_OK")
</pallas_src>

<mosaic_0001>
module attributes {stable_mosaic.version = 11 : i64} {
  func.func @gru_mp_kernel(%arg0: i32, %arg1: memref<1x16x16xf32, #tpu.memory_space<vmem>>, %arg2: memref<1x16x4xi32, #tpu.memory_space<vmem>>, %arg3: memref<16x96xbf16, #tpu.memory_space<vmem>>, %arg4: memref<128x128xbf16, #tpu.memory_space<vmem>>, %arg5: memref<64x64xbf16, #tpu.memory_space<vmem>>, %arg6: memref<1x96xf32, #tpu.memory_space<vmem>>, %arg7: memref<1x16x32xf32, #tpu.memory_space<vmem>>) attributes {dimension_semantics = [#tpu.dimension_semantics<parallel>], iteration_bounds = array<i64: 8>, scalar_prefetch = 0 : i64, scratch_operands = 0 : i64, tpu.core_type = #tpu.core_type<tc>, window_params = [{transform_indices = @transform_0, window_bounds = array<i64: 1, 16, 16>}, {transform_indices = @transform_1, window_bounds = array<i64: 1, 16, 4>}, {pipeline_mode = #tpu.pipeline_mode<synchronous>, transform_indices = @transform_2, window_bounds = array<i64: 16, 96>}, {pipeline_mode = #tpu.pipeline_mode<synchronous>, transform_indices = @transform_3, window_bounds = array<i64: 128, 128>}, {pipeline_mode = #tpu.pipeline_mode<synchronous>, transform_indices = @transform_4, window_bounds = array<i64: 64, 64>}, {pipeline_mode = #tpu.pipeline_mode<synchronous>, transform_indices = @transform_5, window_bounds = array<i64: 1, 96>}, {transform_indices = @transform_6, window_bounds = array<i64: 1, 16, 32>}]} {
    %c0 = arith.constant 0 : index
    %c0_0 = arith.constant 0 : index
    %c0_1 = arith.constant 0 : index
    %0 = vector.load %arg1[%c0, %c0_0, %c0_1] : memref<1x16x16xf32, #tpu.memory_space<vmem>>, vector<1x16x16xf32>
    %1 = vector.shape_cast %0 : vector<1x16x16xf32> to vector<16x16xf32>
    %c0_2 = arith.constant 0 : index
    %c0_3 = arith.constant 0 : index
    %c0_4 = arith.constant 0 : index
    %2 = vector.load %arg2[%c0_2, %c0_3, %c0_4] : memref<1x16x4xi32, #tpu.memory_space<vmem>>, vector<1x16x4xi32>
    %3 = vector.shape_cast %2 : vector<1x16x4xi32> to vector<16x4xi32>
    %c0_5 = arith.constant 0 : index
    %c0_6 = arith.constant 0 : index
    %4 = vector.load %arg3[%c0_5, %c0_6] : memref<16x96xbf16, #tpu.memory_space<vmem>>, vector<16x96xbf16>
    %c0_7 = arith.constant 0 : index
    %c0_8 = arith.constant 0 : index
    %5 = vector.load %arg4[%c0_7, %c0_8] : memref<128x128xbf16, #tpu.memory_space<vmem>>, vector<128x128xbf16>
    %c0_9 = arith.constant 0 : index
    %c0_10 = arith.constant 0 : index
    %6 = vector.load %arg5[%c0_9, %c0_10] : memref<64x64xbf16, #tpu.memory_space<vmem>>, vector<64x64xbf16>
    %c0_11 = arith.constant 0 : index
    %c0_12 = arith.constant 0 : index
    %7 = vector.load %arg6[%c0_11, %c0_12] : memref<1x96xf32, #tpu.memory_space<vmem>>, vector<1x96xf32>
    %8 = tpu.iota {dimensions = array<i32: 0>} : vector<16x1xi32>
    %c0_i32 = arith.constant 0 : i32
    %9 = vector.broadcast %c0_i32 : i32 to vector<16x1xi32>
    %10 = arith.cmpi ne, %8, %9 : vector<16x1xi32>
    %11 = arith.extui %10 : vector<16x1xi1> to vector<16x1xi32>
    %12 = arith.sitofp %11 : vector<16x1xi32> to vector<16x1xf32>
    %13 = tpu.iota {dimensions = array<i32: 1>} : vector<16x16xi32>
    %14 = vector.extract_strided_slice %3 {offsets = [0, 0], sizes = [16, 1], strides = [1, 1]} : vector<16x4xi32> to vector<16x1xi32>
    %15 = vector.broadcast %14 : vector<16x1xi32> to vector<16x16xi32>
    %16 = arith.cmpi eq, %15, %13 : vector<16x16xi32>
    %17 = arith.extui %16 : vector<16x16xi1> to vector<16x16xi32>
    %18 = arith.sitofp %17 : vector<16x16xi32> to vector<16x16xf32>
    %19 = vector.extract_strided_slice %3 {offsets = [0, 1], sizes = [16, 1], strides = [1, 1]} : vector<16x4xi32> to vector<16x1xi32>
    %20 = vector.broadcast %19 : vector<16x1xi32> to vector<16x16xi32>
    %21 = arith.cmpi eq, %20, %13 : vector<16x16xi32>
    %22 = arith.extui %21 : vector<16x16xi1> to vector<16x16xi32>
    %23 = arith.sitofp %22 : vector<16x16xi32> to vector<16x16xf32>
    %24 = vector.extract_strided_slice %3 {offsets = [0, 2], sizes = [16, 1], strides = [1, 1]} : vector<16x4xi32> to vector<16x1xi32>
    %25 = vector.broadcast %24 : vector<16x1xi32> to vector<16x16xi32>
    %26 = arith.cmpi eq, %25, %13 : vector<16x16xi32>
    %27 = arith.extui %26 : vector<16x16xi1> to vector<16x16xi32>
    %28 = arith.sitofp %27 : vector<16x16xi32> to vector<16x16xf32>
    %29 = vector.extract_strided_slice %3 {offsets = [0, 3], sizes = [16, 1], strides = [1, 1]} : vector<16x4xi32> to vector<16x1xi32>
    %30 = vector.broadcast %29 : vector<16x1xi32> to vector<16x16xi32>
    %31 = arith.cmpi eq, %30, %13 : vector<16x16xi32>
    %32 = arith.extui %31 : vector<16x16xi1> to vector<16x16xi32>
    %33 = arith.sitofp %32 : vector<16x16xi32> to vector<16x16xf32>
    %34 = arith.truncf %1 : vector<16x16xf32> to vector<16x16xbf16>
    %cst = arith.constant dense<0.000000e+00> : vector<16x96xf32>
    %35 = tpu.matmul %34, %4, %cst {dimension_numbers = #tpu.dot_dimension_numbers<[1], [0], [0], [1], [0, 0, 1, 1], [], []>} : vector<16x16xbf16>, vector<16x96xbf16>, vector<16x96xf32> -> vector<16x96xf32>
    %36 = vector.broadcast %7 : vector<1x96xf32> to vector<16x96xf32>
    %37 = arith.addf %35, %36 : vector<16x96xf32>
    %38 = vector.extract_strided_slice %37 {offsets = [0, 0], sizes = [16, 32], strides = [1, 1]} : vector<16x96xf32> to vector<16x32xf32>
    %39 = vector.extract_strided_slice %37 {offsets = [0, 32], sizes = [16, 64], strides = [1, 1]} : vector<16x96xf32> to vector<16x64xf32>
    %40 = tpu.concatenate %38, %38, %38, %38 in 1 : vector<16x32xf32>, vector<16x32xf32>, vector<16x32xf32>, vector<16x32xf32> -> vector<16x128xf32>
    %cst_13 = arith.constant 0.000000e+00 : f32
    %41 = vector.broadcast %cst_13 : f32 to vector<16x32xf32>
    %cst_14 = arith.constant dense<0.000000e+00> : vector<16x32xf32>
    %42 = tpu.matmul %18, %41, %cst_14 {dimension_numbers = #tpu.dot_dimension_numbers<[1], [0], [0], [1], [0, 0, 1, 1], [], []>} : vector<16x16xf32>, vector<16x32xf32>, vector<16x32xf32> -> vector<16x32xf32>
    %cst_15 = arith.constant dense<0.000000e+00> : vector<16x32xf32>
    %43 = tpu.matmul %23, %41, %cst_15 {dimension_numbers = #tpu.dot_dimension_numbers<[1], [0], [0], [1], [0, 0, 1, 1], [], []>} : vector<16x16xf32>, vector<16x32xf32>, vector<16x32xf32> -> vector<16x32xf32>
    %cst_16 = arith.constant dense<0.000000e+00> : vector<16x32xf32>
    %44 = tpu.matmul %28, %41, %cst_16 {dimension_numbers = #tpu.dot_dimension_numbers<[1], [0], [0], [1], [0, 0, 1, 1], [], []>} : vector<16x16xf32>, vector<16x32xf32>, vector<16x32xf32> -> vector<16x32xf32>
    %cst_17 = arith.constant dense<0.000000e+00> : vector<16x32xf32>
    %45 = tpu.matmul %33, %41, %cst_17 {dimension_numbers = #tpu.dot_dimension_numbers<[1], [0], [0], [1], [0, 0, 1, 1], [], []>} : vector<16x16xf32>, vector<16x32xf32>, vector<16x32xf32> -> vector<16x32xf32>
    %46 = tpu.concatenate %42, %43, %44, %45 in 1 : vector<16x32xf32>, vector<16x32xf32>, vector<16x32xf32>, vector<16x32xf32> -> vector<16x128xf32>
    %47 = arith.truncf %46 : vector<16x128xf32> to vector<16x128xbf16>
    %cst_18 = arith.constant dense<0.000000e+00> : vector<16x128xf32>
    %48 = tpu.matmul %47, %5, %cst_18 {dimension_numbers = #tpu.dot_dimension_numbers<[1], [0], [0], [1], [0, 0, 1, 1], [], []>} : vector<16x128xbf16>, vector<128x128xbf16>, vector<16x128xf32> -> vector<16x128xf32>
    %49 = arith.addf %40, %48 : vector<16x128xf32>
    %50 = arith.negf %49 : vector<16x128xf32>
    %51 = math.exp %50 : vector<16x128xf32>
    %cst_19 = arith.constant 1.000000e+00 : f32
    %52 = vector.broadcast %cst_19 : f32 to vector<16x128xf32>
    %53 = arith.addf %52, %51 : vector<16x128xf32>
    %54 = arith.divf %52, %53 : vector<16x128xf32>
    %55 = arith.mulf %54, %46 : vector<16x128xf32>
    %56 = vector.extract_strided_slice %46 {offsets = [0, 0], sizes = [16, 32], strides = [1, 1]} : vector<16x128xf32> to vector<16x32xf32>
    %57 = vector.extract_strided_slice %55 {offsets = [0, 0], sizes = [16, 32], strides = [1, 1]} : vector<16x128xf32> to vector<16x32xf32>
    %58 = vector.extract_strided_slice %46 {offsets = [0, 32], sizes = [16, 32], strides = [1, 1]} : vector<16x128xf32> to vector<16x32xf32>
    %59 = arith.addf %56, %58 : vector<16x32xf32>
    %60 = vector.extract_strided_slice %55 {offsets = [0, 32], sizes = [16, 32], strides = [1, 1]} : vector<16x128xf32> to vector<16x32xf32>
    %61 = arith.addf %57, %60 : vector<16x32xf32>
    %62 = vector.extract_strided_slice %46 {offsets = [0, 64], sizes = [16, 32], strides = [1, 1]} : vector<16x128xf32> to vector<16x32xf32>
    %63 = arith.addf %59, %62 : vector<16x32xf32>
    %64 = vector.extract_strided_slice %55 {offsets = [0, 64], sizes = [16, 32], strides = [1, 1]} : vector<16x128xf32> to vector<16x32xf32>
    %65 = arith.addf %61, %64 : vector<16x32xf32>
    %66 = vector.extract_strided_slice %46 {offsets = [0, 96], sizes = [16, 32], strides = [1, 1]} : vector<16x128xf32> to vector<16x32xf32>
    %67 = arith.addf %63, %66 : vector<16x32xf32>
    %68 = vector.extract_strided_slice %55 {offsets = [0, 96], sizes = [16, 32], strides = [1, 1]} : vector<16x128xf32> to vector<16x32xf32>
    %69 = arith.addf %65, %68 : vector<16x32xf32>
    %70 = tpu.concatenate %67, %69 in 1 : vector<16x32xf32>, vector<16x32xf32> -> vector<16x64xf32>
    %71 = arith.truncf %70 : vector<16x64xf32> to vector<16x64xbf16>
    %cst_20 = arith.constant dense<0.000000e+00> : vector<16x64xf32>
    %72 = tpu.matmul %71, %6, %cst_20 {dimension_numbers = #tpu.dot_dimension_numbers<[1], [0], [0], [1], [0, 0, 1, 1], [], []>} : vector<16x64xbf16>, vector<64x64xbf16>, vector<16x64xf32> -> vector<16x64xf32>
    %73 = arith.addf %39, %72 : vector<16x64xf32>
    %74 = vector.extract_strided_slice %73 {offsets = [0, 0], sizes = [16, 32], strides = [1, 1]} : vector<16x64xf32> to vector<16x32xf32>
    %75 = arith.negf %74 : vector<16x32xf32>
    %76 = math.exp %75 : vector<16x32xf32>
    %cst_21 = arith.constant 1.000000e+00 : f32
    %77 = vector.broadcast %cst_21 : f32 to vector<16x32xf32>
    %78 = arith.addf %77, %76 : vector<16x32xf32>
    %79 = arith.divf %77, %78 : vector<16x32xf32>
    %80 = vector.extract_strided_slice %73 {offsets = [0, 32], sizes = [16, 32], strides = [1, 1]} : vector<16x64xf32> to vector<16x32xf32>
    %81 = math.tanh %80 : vector<16x32xf32>
    %cst_22 = arith.constant 1.000000e+00 : f32
    %82 = vector.broadcast %cst_22 : f32 to vector<16x32xf32>
    %83 = arith.subf %82, %79 : vector<16x32xf32>
    %84 = arith.mulf %83, %67 : vector<16x32xf32>
    %85 = arith.mulf %79, %81 : vector<16x32xf32>
    %86 = arith.addf %84, %85 : vector<16x32xf32>
    %87 = vector.broadcast %12 : vector<16x1xf32> to vector<16x32xf32>
    %88 = arith.mulf %86, %87 : vector<16x32xf32>
    %cst_23 = arith.constant dense<0.000000e+00> : vector<16x32xf32>
    %89 = tpu.matmul %18, %88, %cst_23 {dimension_numbers = #tpu.dot_dimension_numbers<[1], [0], [0], [1], [0, 0, 1, 1], [], []>} : vector<16x16xf32>, vector<16x32xf32>, vector<16x32xf32> -> vector<16x32xf32>
    %cst_24 = arith.constant dense<0.000000e+00> : vector<16x32xf32>
    %90 = tpu.matmul %23, %88, %cst_24 {dimension_numbers = #tpu.dot_dimension_numbers<[1], [0], [0], [1], [0, 0, 1, 1], [], []>} : vector<16x16xf32>, vector<16x32xf32>, vector<16x32xf32> -> vector<16x32xf32>
    %cst_25 = arith.constant dense<0.000000e+00> : vector<16x32xf32>
    %91 = tpu.matmul %28, %88, %cst_25 {dimension_numbers = #tpu.dot_dimension_numbers<[1], [0], [0], [1], [0, 0, 1, 1], [], []>} : vector<16x16xf32>, vector<16x32xf32>, vector<16x32xf32> -> vector<16x32xf32>
    %cst_26 = arith.constant dense<0.000000e+00> : vector<16x32xf32>
    %92 = tpu.matmul %33, %88, %cst_26 {dimension_numbers = #tpu.dot_dimension_numbers<[1], [0], [0], [1], [0, 0, 1, 1], [], []>} : vector<16x16xf32>, vector<16x32xf32>, vector<16x32xf32> -> vector<16x32xf32>
    %93 = tpu.concatenate %89, %90, %91, %92 in 1 : vector<16x32xf32>, vector<16x32xf32>, vector<16x32xf32>, vector<16x32xf32> -> vector<16x128xf32>
    %94 = arith.truncf %93 : vector<16x128xf32> to vector<16x128xbf16>
    %cst_27 = arith.constant dense<0.000000e+00> : vector<16x128xf32>
    %95 = tpu.matmul %94, %5, %cst_27 {dimension_numbers = #tpu.dot_dimension_numbers<[1], [0], [0], [1], [0, 0, 1, 1], [], []>} : vector<16x128xbf16>, vector<128x128xbf16>, vector<16x128xf32> -> vector<16x128xf32>
    %96 = arith.addf %40, %95 : vector<16x128xf32>
    %97 = arith.negf %96 : vector<16x128xf32>
    %98 = math.exp %97 : vector<16x128xf32>
    %cst_28 = arith.constant 1.000000e+00 : f32
    %99 = vector.broadcast %cst_28 : f32 to vector<16x128xf32>
    %100 = arith.addf %99, %98 : vector<16x128xf32>
    %101 = arith.divf %99, %100 : vector<16x128xf32>
    %102 = arith.mulf %101, %93 : vector<16x128xf32>
    %103 = vector.extract_strided_slice %93 {offsets = [0, 0], sizes = [16, 32], strides = [1, 1]} : vector<16x128xf32> to vector<16x32xf32>
    %104 = vector.extract_strided_slice %102 {offsets = [0, 0], sizes = [16, 32], strides = [1, 1]} : vector<16x128xf32> to vector<16x32xf32>
    %105 = vector.extract_strided_slice %93 {offsets = [0, 32], sizes = [16, 32], strides = [1, 1]} : vector<16x128xf32> to vector<16x32xf32>
    %106 = arith.addf %103, %105 : vector<16x32xf32>
    %107 = vector.extract_strided_slice %102 {offsets = [0, 32], sizes = [16, 32], strides = [1, 1]} : vector<16x128xf32> to vector<16x32xf32>
    %108 = arith.addf %104, %107 : vector<16x32xf32>
    %109 = vector.extract_strided_slice %93 {offsets = [0, 64], sizes = [16, 32], strides = [1, 1]} : vector<16x128xf32> to vector<16x32xf32>
    %110 = arith.addf %106, %109 : vector<16x32xf32>
    %111 = vector.extract_strided_slice %102 {offsets = [0, 64], sizes = [16, 32], strides = [1, 1]} : vector<16x128xf32> to vector<16x32xf32>
    %112 = arith.addf %108, %111 : vector<16x32xf32>
    %113 = vector.extract_strided_slice %93 {offsets = [0, 96], sizes = [16, 32], strides = [1, 1]} : vector<16x128xf32> to vector<16x32xf32>
    %114 = arith.addf %110, %113 : vector<16x32xf32>
    %115 = vector.extract_strided_slice %102 {offsets = [0, 96], sizes = [16, 32], strides = [1, 1]} : vector<16x128xf32> to vector<16x32xf32>
    %116 = arith.addf %112, %115 : vector<16x32xf32>
    %117 = tpu.concatenate %114, %116 in 1 : vector<16x32xf32>, vector<16x32xf32> -> vector<16x64xf32>
    %118 = arith.truncf %117 : vector<16x64xf32> to vector<16x64xbf16>
    %cst_29 = arith.constant dense<0.000000e+00> : vector<16x64xf32>
    %119 = tpu.matmul %118, %6, %cst_29 {dimension_numbers = #tpu.dot_dimension_numbers<[1], [0], [0], [1], [0, 0, 1, 1], [], []>} : vector<16x64xbf16>, vector<64x64xbf16>, vector<16x64xf32> -> vector<16x64xf32>
    %120 = arith.addf %39, %119 : vector<16x64xf32>
    %121 = vector.extract_strided_slice %120 {offsets = [0, 0], sizes = [16, 32], strides = [1, 1]} : vector<16x64xf32> to vector<16x32xf32>
    %122 = arith.negf %121 : vector<16x32xf32>
    %123 = math.exp %122 : vector<16x32xf32>
    %cst_30 = arith.constant 1.000000e+00 : f32
    %124 = vector.broadcast %cst_30 : f32 to vector<16x32xf32>
    %125 = arith.addf %124, %123 : vector<16x32xf32>
    %126 = arith.divf %124, %125 : vector<16x32xf32>
    %127 = vector.extract_strided_slice %120 {offsets = [0, 32], sizes = [16, 32], strides = [1, 1]} : vector<16x64xf32> to vector<16x32xf32>
    %128 = math.tanh %127 : vector<16x32xf32>
    %cst_31 = arith.constant 1.000000e+00 : f32
    %129 = vector.broadcast %cst_31 : f32 to vector<16x32xf32>
    %130 = arith.subf %129, %126 : vector<16x32xf32>
    %131 = arith.mulf %130, %114 : vector<16x32xf32>
    %132 = arith.mulf %126, %128 : vector<16x32xf32>
    %133 = arith.addf %131, %132 : vector<16x32xf32>
    %134 = vector.broadcast %12 : vector<16x1xf32> to vector<16x32xf32>
    %135 = arith.mulf %133, %134 : vector<16x32xf32>
    %cst_32 = arith.constant dense<0.000000e+00> : vector<16x32xf32>
    %136 = tpu.matmul %18, %135, %cst_32 {dimension_numbers = #tpu.dot_dimension_numbers<[1], [0], [0], [1], [0, 0, 1, 1], [], []>} : vector<16x16xf32>, vector<16x32xf32>, vector<16x32xf32> -> vector<16x32xf32>
    %cst_33 = arith.constant dense<0.000000e+00> : vector<16x32xf32>
    %137 = tpu.matmul %23, %135, %cst_33 {dimension_numbers = #tpu.dot_dimension_numbers<[1], [0], [0], [1], [0, 0, 1, 1], [], []>} : vector<16x16xf32>, vector<16x32xf32>, vector<16x32xf32> -> vector<16x32xf32>
    %cst_34 = arith.constant dense<0.000000e+00> : vector<16x32xf32>
    %138 = tpu.matmul %28, %135, %cst_34 {dimension_numbers = #tpu.dot_dimension_numbers<[1], [0], [0], [1], [0, 0, 1, 1], [], []>} : vector<16x16xf32>, vector<16x32xf32>, vector<16x32xf32> -> vector<16x32xf32>
    %cst_35 = arith.constant dense<0.000000e+00> : vector<16x32xf32>
    %139 = tpu.matmul %33, %135, %cst_35 {dimension_numbers = #tpu.dot_dimension_numbers<[1], [0], [0], [1], [0, 0, 1, 1], [], []>} : vector<16x16xf32>, vector<16x32xf32>, vector<16x32xf32> -> vector<16x32xf32>
    %140 = tpu.concatenate %136, %137, %138, %139 in 1 : vector<16x32xf32>, vector<16x32xf32>, vector<16x32xf32>, vector<16x32xf32> -> vector<16x128xf32>
    %141 = arith.truncf %140 : vector<16x128xf32> to vector<16x128xbf16>
    %cst_36 = arith.constant dense<0.000000e+00> : vector<16x128xf32>
    %142 = tpu.matmul %141, %5, %cst_36 {dimension_numbers = #tpu.dot_dimension_numbers<[1], [0], [0], [1], [0, 0, 1, 1], [], []>} : vector<16x128xbf16>, vector<128x128xbf16>, vector<16x128xf32> -> vector<16x128xf32>
    %143 = arith.addf %40, %142 : vector<16x128xf32>
    %144 = arith.negf %143 : vector<16x128xf32>
    %145 = math.exp %144 : vector<16x128xf32>
    %cst_37 = arith.constant 1.000000e+00 : f32
    %146 = vector.broadcast %cst_37 : f32 to vector<16x128xf32>
    %147 = arith.addf %146, %145 : vector<16x128xf32>
    %148 = arith.divf %146, %147 : vector<16x128xf32>
    %149 = arith.mulf %148, %140 : vector<16x128xf32>
    %150 = vector.extract_strided_slice %140 {offsets = [0, 0], sizes = [16, 32], strides = [1, 1]} : vector<16x128xf32> to vector<16x32xf32>
    %151 = vector.extract_strided_slice %149 {offsets = [0, 0], sizes = [16, 32], strides = [1, 1]} : vector<16x128xf32> to vector<16x32xf32>
    %152 = vector.extract_strided_slice %140 {offsets = [0, 32], sizes = [16, 32], strides = [1, 1]} : vector<16x128xf32> to vector<16x32xf32>
    %153 = arith.addf %150, %152 : vector<16x32xf32>
    %154 = vector.extract_strided_slice %149 {offsets = [0, 32], sizes = [16, 32], strides = [1, 1]} : vector<16x128xf32> to vector<16x32xf32>
    %155 = arith.addf %151, %154 : vector<16x32xf32>
    %156 = vector.extract_strided_slice %140 {offsets = [0, 64], sizes = [16, 32], strides = [1, 1]} : vector<16x128xf32> to vector<16x32xf32>
    %157 = arith.addf %153, %156 : vector<16x32xf32>
    %158 = vector.extract_strided_slice %149 {offsets = [0, 64], sizes = [16, 32], strides = [1, 1]} : vector<16x128xf32> to vector<16x32xf32>
    %159 = arith.addf %155, %158 : vector<16x32xf32>
    %160 = vector.extract_strided_slice %140 {offsets = [0, 96], sizes = [16, 32], strides = [1, 1]} : vector<16x128xf32> to vector<16x32xf32>
    %161 = arith.addf %157, %160 : vector<16x32xf32>
    %162 = vector.extract_strided_slice %149 {offsets = [0, 96], sizes = [16, 32], strides = [1, 1]} : vector<16x128xf32> to vector<16x32xf32>
    %163 = arith.addf %159, %162 : vector<16x32xf32>
    %164 = tpu.concatenate %161, %163 in 1 : vector<16x32xf32>, vector<16x32xf32> -> vector<16x64xf32>
    %165 = arith.truncf %164 : vector<16x64xf32> to vector<16x64xbf16>
    %cst_38 = arith.constant dense<0.000000e+00> : vector<16x64xf32>
    %166 = tpu.matmul %165, %6, %cst_38 {dimension_numbers = #tpu.dot_dimension_numbers<[1], [0], [0], [1], [0, 0, 1, 1], [], []>} : vector<16x64xbf16>, vector<64x64xbf16>, vector<16x64xf32> -> vector<16x64xf32>
    %167 = arith.addf %39, %166 : vector<16x64xf32>
    %168 = vector.extract_strided_slice %167 {offsets = [0, 0], sizes = [16, 32], strides = [1, 1]} : vector<16x64xf32> to vector<16x32xf32>
    %169 = arith.negf %168 : vector<16x32xf32>
    %170 = math.exp %169 : vector<16x32xf32>
    %cst_39 = arith.constant 1.000000e+00 : f32
    %171 = vector.broadcast %cst_39 : f32 to vector<16x32xf32>
    %172 = arith.addf %171, %170 : vector<16x32xf32>
    %173 = arith.divf %171, %172 : vector<16x32xf32>
    %174 = vector.extract_strided_slice %167 {offsets = [0, 32], sizes = [16, 32], strides = [1, 1]} : vector<16x64xf32> to vector<16x32xf32>
    %175 = math.tanh %174 : vector<16x32xf32>
    %cst_40 = arith.constant 1.000000e+00 : f32
    %176 = vector.broadcast %cst_40 : f32 to vector<16x32xf32>
    %177 = arith.subf %176, %173 : vector<16x32xf32>
    %178 = arith.mulf %177, %161 : vector<16x32xf32>
    %179 = arith.mulf %173, %175 : vector<16x32xf32>
    %180 = arith.addf %178, %179 : vector<16x32xf32>
    %181 = vector.broadcast %12 : vector<16x1xf32> to vector<16x32xf32>
    %182 = arith.mulf %180, %181 : vector<16x32xf32>
    %c0_41 = arith.constant 0 : index
    %c0_42 = arith.constant 0 : index
    %c0_43 = arith.constant 0 : index
    %183 = vector.load %arg7[%c0_41, %c0_42, %c0_43] : memref<1x16x32xf32, #tpu.memory_space<vmem>>, vector<1x16x32xf32>
    %184 = vector.shape_cast %183 : vector<1x16x32xf32> to vector<16x32xf32>
    %185 = vector.shape_cast %182 : vector<16x32xf32> to vector<1x16x32xf32>
    tpu.vector_store %arg7[%c0_41, %c0_42, %c0_43], %185 {strides = array<i32>} : memref<1x16x32xf32, #tpu.memory_space<vmem>>, vector<1x16x32xf32>,
    return
  }
  func.func @transform_0(%arg0: i32) -> (i32, i32, i32) {
    %c0_i32 = arith.constant 0 : i32
    %c0_i32_0 = arith.constant 0 : i32
    %c0_i32_1 = arith.constant 0 : i32
    return %arg0, %c0_i32, %c0_i32_0 : i32, i32, i32
  }
  func.func @transform_1(%arg0: i32) -> (i32, i32, i32) {
    %c0_i32 = arith.constant 0 : i32
    %c0_i32_0 = arith.constant 0 : i32
    %c0_i32_1 = arith.constant 0 : i32
    return %arg0, %c0_i32, %c0_i32_0 : i32, i32, i32
  }
  func.func @transform_2(%arg0: i32) -> (i32, i32) {
    %c0_i32 = arith.constant 0 : i32
    %c0_i32_0 = arith.constant 0 : i32
    %c0_i32_1 = arith.constant 0 : i32
    return %c0_i32, %c0_i32_0 : i32, i32
  }
  func.func @transform_3(%arg0: i32) -> (i32, i32) {
    %c0_i32 = arith.constant 0 : i32
    %c0_i32_0 = arith.constant 0 : i32
    %c0_i32_1 = arith.constant 0 : i32
    return %c0_i32, %c0_i32_0 : i32, i32
  }
  func.func @transform_4(%arg0: i32) -> (i32, i32) {
    %c0_i32 = arith.constant 0 : i32
    %c0_i32_0 = arith.constant 0 : i32
    %c0_i32_1 = arith.constant 0 : i32
    return %c0_i32, %c0_i32_0 : i32, i32
  }
  func.func @transform_5(%arg0: i32) -> (i32, i32) {
    %c0_i32 = arith.constant 0 : i32
    %c0_i32_0 = arith.constant 0 : i32
    %c0_i32_1 = arith.constant 0 : i32
    return %c0_i32, %c0_i32_0 : i32, i32
  }
  func.func @transform_6(%arg0: i32) -> (i32, i32, i32) {
    %c0_i32 = arith.constant 0 : i32
    %c0_i32_0 = arith.constant 0 : i32
    %c0_i32_1 = arith.constant 0 : i32
    return %arg0, %c0_i32, %c0_i32_0 : i32, i32, i32
  }
}

</mosaic_0001>

<bundles_post_ra>
// kernel: gru_forward.1
= control target key start
LH: loop header
LB: loop body
LE: loop exit
PB: predicated region body
PF: predicated region fallthrough
CT: control target
= control target key end

     0   :  { %11 = vsyncpa [#allocation3], 0  ;;  %s2491_s0 = inlined_call_operand.vmem [shape: f32[8,16,16], index: 0, kind: input, shape index: {}]   ;;  %s2492_s1 = inlined_call_operand.vmem [shape: s32[8,16,4], index: 1, kind: input, shape index: {}]   ;;  %s2493_s2 = inlined_call_operand.vmem [shape: bf16[16,96], index: 2, kind: input, shape index: {}]   ;;  %s2494_s3 = inlined_call_operand.vmem [shape: bf16[128,128], index: 3, kind: input, shape index: {}]   ;;  %s2495_s4 = inlined_call_operand.vmem [shape: bf16[64,64], index: 4, kind: input, shape index: {}]   ;;  %s2496_s5 = inlined_call_operand.vmem [shape: f32[1,96], index: 5, kind: input, shape index: {}]   ;;  %s2497_s6 = inlined_call_operand.hbm [shape: f32[8,16,32], index: 6, kind: output, shape index: {}]  }
   0x1   :  { %13 = vsyncpa [#allocation3 + $0x1], 0  ;;  %s2019_s21 = smov 0   ;;  %s2021_s22 = smov 0  }
   0x2   :  { %s2023_s23 = smov 0   ;;  %s2025_s24 = smov 0  }
   0x3 LB: > { %s2040_s25 = sadd.s32 4294967295, %s1972_s24   ;;  %s1635_s26 = sadd.s32 4294967294, %s1972_s24   ;;  %s1972_s24 = sphi %s2025_s24, %s2503_s24   ;;  %s1968_s23 = sphi %s2023_s23, %s2502_s23   ;;  %s1964_s22 = sphi %s2021_s22, %s2501_s22   ;;  %s1960_s21 = sphi %s2019_s21, %s2500_s21  }
   0x4   : > { %s2044_s27 = sadd.s32 1, %s1972_s24   ;;  %s162_s28 = sadd.s32 1, %s1968_s23 }
   0x5   : > { %s159_s29 = ssub.s32 %s1972_s24, %s2044_s27  ;;  %p172_p0 = scmp.ne.s32.totalorder %s1968_s23, %s1964_s22 }
   0x6   : > { %p160_p1 = scmp.eq.s32.totalorder %s159_s29, 0  ;;  %p173_p2 = scmp.eq.s32.totalorder %s2040_s25, 7 }
   0x7   : > { %p178_p3 = scmp.ne.s32.totalorder %s1964_s22, %s1960_s21  ;;  %p179_p4 = scmp.eq.s32.totalorder %s1635_s26, 7 }
   0x8   : > { %s2055_s30 = scalar_select %p160_p1, %s1968_s23, %s162_s28  }
   0x9   : > { %p2057_p5 = por %p173_p2, %p172_p0  ;;  %p2061_p6 = por %p179_p4, %p178_p3 }
   0xa   : > { %p1638_p7 = scmp.ge.s32.totalorder %s1972_s24, 1  ;;  %p225_p8 = scmp.lt.s32.totalorder %s1972_s24, 9 }
   0xc   : > { %p226_p9 = pnand %p1638_p7, %p225_p8 }
   0xd   : > { %p260_p10 = scmp.lt.s32.totalorder (!%p226_p9), %s2040_s25, 7  ;;  %s1979_s19 = smov (!%p226_p9), 32  }
   0xe   : > { %229 = sbr.rel (%p226_p9) target bundleno = 3638 (0xe36), region = 44  ;;  %s1980_s20 = smov (!%p226_p9), 64  }
   0xf   : > { %s1981_s29 = smov (!%p226_p9), 96   ;;  %s1930_s26 = scalar_lea.hbm (!%p226_p9), %s2497_s6, 128 }
  0x13   : > { %v1974_v0 = vmov 1   ;;  %v1975_v1 = vmov 0   ;;  %s261_s9 = scalar_select %p260_p10, %s2040_s25, 7  ;;  %v1976_v2 = vmov 0.0   ;;  %v1977_v5 = vmov 2   ;;  %v1752_v7 = vld [vmem:[%s2493_s2] sm:$0xff] }
  0x14   : > { %1817 = vset.pattern.permute.xlu1 %v1974_v0  ;;  %1816 = vset.pattern.permute.xlu0 %v1975_v1  ;;  %v1978_v6 = vmov 3   ;;  %vm371_vm0 = vcmask 130048   ;;  %v302_v11 = vlaneseq  ;;  %v1849_v36 = vld [vmem:[%s2496_s5] ss:$0 sm:$0xff]  ;;  %v2153_v42 = vld [vmem:[%s2494_s3 + $0x38] sm:$0xff]  ;;  %v2159_v43 = vld [vmem:[%s2494_s3 + $0x30] sm:$0xff] }
  0x15   : > { %1819 = vset.pattern.permute.xlu2 %v1974_v0  ;;  %1766 = vmatpush.msra.mxu3 %v1976_v2  ;;  %s1750_s10 = sshll.u32 %s261_s9, 4  ;;  %v2165_v44 = vld [vmem:[%s2494_s3 + $0x28] sm:$0xff]  ;;  %v2171_v45 = vld [vmem:[%s2494_s3 + $0x20] sm:$0xff]  ;;  %v2177_v46 = vld [vmem:[%s2494_s3 + $0x18] sm:$0xff]  ;;  %vm409_vm9 = vcmask 261120   ;;  %vm412_vm10 = vcmask 523264  }
  0x16   : > { %468 = vmatpush.msra.mxu2 %v1976_v2  ;;  %439 = vmatpush.msra.mxu1 %v1976_v2  ;;  %s269_s13 = scalar_lea.vmem %s2492_s1, %s1750_s10  ;;  %s264_s16 = scalar_lea.vmem %s2491_s0, %s1750_s10  ;;  %v312_v12 = vand.u32 127, %v302_v11  ;;  %v2183_v47 = vld [vmem:[%s2494_s3 + $0x10] sm:$0xff]  ;;  %v2189_v48 = vld [vmem:[%s2494_s3 + $0x8] sm:$0xff]  ;;  %v2195_v49 = vld [vmem:[%s2494_s3] sm:$0xff]  ;;  %vm415_vm11 = vcmask 785408  }
  0x17   : > { %497 = vmatpush.msrb.mxu3 %v1976_v2  ;;  %v274_v3 = vld [vmem:[%s269_s13 + $0x8] sm:$0xff]  ;;  %v273_v4 = vld [vmem:[%s269_s13] sm:$0xff]  ;;  %382 = vmatpush.bf16.msra.mxu0 %v1752_v7  ;;  %s1765_s10 = sshll.u32 %s2040_s25, 4 }
  0x18   : > { %526 = vmatpush.msrb.mxu1 %v1976_v2  ;;  %317 = vperm.xlu0 %1816, %v274_v3   ;;  %v271_v8 = vld [vmem:[%s264_s16] sm:$0xff]  ;;  %v272_v9 = vld [vmem:[%s264_s16 + $0x8] sm:$0xff]  ;;  %s1557_s13 = scalar_lea.hbm %s2497_s6, %s1765_s10 }
  0x19   : > { %326 = vperm.xlu1 %1817, %v273_v4   ;;  %329 = vperm.xlu2 %1819, %v274_v3   ;;  %v361_v10 = vpack.c.bf16 %v272_v9, %v271_v8  ;;  %s1560_s15 = sshll.u32 %s1557_s13, 4  ;;  %s1561_s15 = int_to_ptr.hbm [resolvable:$true] %s1560_s15 }
  0x1a   : > { %613 = vmatpush.bf16.msrb.mxu2 %v2153_v42  ;;  %s1924_s16 = sshra.s32 %s1561_s15, 4  ;;  %s1925_s16 = int_to_ptr.hbm [resolvable:$true] %s1924_s16 }
  0x1b   : > { %1657 = vmatmul.msk.bf16.vlgmr.msra.gmra.mxu0 %vm371_vm0, %v361_v10  ;;  %s1926_s17 = scalar_lea.hbm %s1925_s16, 16  ;;  %p1931_p0 = scmp.lt.s32.totalorder %s1925_s16, %s2497_s6 }
  0x1c   : > { %p1927_p11 = scmp.ne.s32.totalorder %s1925_s16, %s1926_s17  ;;  %p1932_p1 = scmp.lt.s32.totalorder %s1930_s26, %s1926_s17 }
  0x1e   : > { %614 = vmatpush.bf16.msrb.mxu2 %v2159_v43  ;;  %p1928_p12 = pnand %p1927_p11, %p2057_p5  ;;  %p1933_p2 = por %p1932_p1, %p1931_p0 }
  0x20   : > { %314 = vperm.xlu0 %1816, %v273_v4   ;;  %p1929_p13 = pneg %p1928_p12 }
  0x21   : > { %1818 = vset.pattern.permute.xlu1 %v1977_v5  ;;  %1820 = vset.pattern.permute.xlu2 %v1978_v6 }
  0x22   : > { %338 = vperm.xlu1 %1818, %v273_v4   ;;  %350 = vperm.xlu2 %1820, %v273_v4   ;;  %p1934_p3 = pnand %p1933_p2, %p1929_p13 }
  0x23   : > { %615 = vmatpush.bf16.msrb.mxu2 %v2165_v44 }
  0x27   : > { %616 = vmatpush.bf16.msrb.mxu2 %v2171_v45 }
  0x28   : > { %1821 = vset.pattern.permute.xlu0 %v1977_v5 }
  0x29   : > { %341 = vperm.xlu0 %1821, %v274_v3  }
  0x2a   : > { %1822 = vset.pattern.permute.xlu1 %v1978_v6 }
  0x2b   : > { %353 = vperm.xlu1 %1822, %v274_v3   ;;  %617 = vmatpush.bf16.msrb.mxu2 %v2177_v46 }
  0x2f   : > { %618 = vmatpush.bf16.msrb.mxu2 %v2183_v47 }
  0x31   : > { %1848 = vset.pattern.permute.xlu0 %v1978_v6 }
  0x33   : > { %619 = vmatpush.bf16.msrb.mxu2 %v2189_v48 }
  0x37   : > { %620 = vmatpush.bf16.msrb.mxu2 %v2195_v49 }
  0x73   : > { %v330_v17 = vpop.permute.xlu2 %329 }
  0x74   : > { %vm332_vm3 = vcmp.eq.s32.totalorder %v330_v17, %v312_v12 }
  0x75   : > { %v2096_v18 = vsel %vm332_vm3, 1.0, %v1976_v2 }
  0x7c   : > { %v351_v22 = vpop.permute.xlu2 %350 }
  0x7d   : > { %vm355_vm6 = vcmp.eq.s32.totalorder %v351_v22, %v312_v12 }
  0x7e   : > { %v2111_v24 = vsel %vm355_vm6, 1.0, %v1976_v2 }
  0x8a   : > { %v318_v13 = vpop.permute.xlu0 %317 }
  0x8b   : > { %v327_v14 = vpop.permute.xlu1 %326  ;;  %vm320_vm1 = vcmp.eq.s32.totalorder %v318_v13, %v312_v12 }
  0x8c   : > { %vm331_vm2 = vcmp.eq.s32.totalorder %v327_v14, %v312_v12  ;;  %v2086_v15 = vsel %vm320_vm1, 1.0, %v1976_v2 }
  0x8d   : > { %v2089_v16 = vsel %vm331_vm2, 1.0, %v1976_v2  ;;  %1659 = vmatmul.msk.f32.vlgmr.msra.gmra.mxu3 %vm371_vm0, %v2086_v15 }
  0x8e   : > { %1660 = vmatmul.msk.f32.vlgmr.msra.gmra.mxu2 %vm371_vm0, %v2089_v16 }
  0x92   : > { %v315_v19 = vpop.permute.xlu0 %314 }
  0x93   : > { %vm319_vm4 = vcmp.eq.s32.totalorder %v315_v19, %v312_v12 }
  0x94   : > { %v339_v20 = vpop.permute.xlu1 %338  ;;  %v2099_v21 = vsel %vm319_vm4, 1.0, %v1976_v2 }
  0x95   : > { %vm343_vm5 = vcmp.eq.s32.totalorder %v339_v20, %v312_v12  ;;  %1658 = vmatmul.msk.f32.vlgmr.msra.gmra.mxu1 %vm371_vm0, %v2099_v21 }
  0x96   : > { %v2102_v23 = vsel %vm343_vm5, 1.0, %v1976_v2  ;;  %1661 = vmatmul.msk.f32.gmra.mxu2 %vm371_vm0, %v2096_v18 }
  0x97   : > { %1662 = vmatmul.msk.f32.vlgmr.msrb.gmra.mxu3 %vm371_vm0, %v2102_v23 }
  0x98   : > { %v384_v33 = vpop.f32.mrf.mxu0 }
  0x99   : > { %v2136_v41 = vadd.f32 %v1849_v36, %v384_v33 }
  0x9b   : > { %v342_v25 = vpop.permute.xlu0 %341 }
  0x9c   : > { %vm344_vm7 = vcmp.eq.s32.totalorder %v342_v25, %v312_v12 }
  0x9d   : > { %v354_v26 = vpop.permute.xlu1 %353  ;;  %v2114_v27 = vsel %vm344_vm7, 1.0, %v1976_v2  ;;  %1664 = vmatmul.msk.f32.vlgmr.msrb.gmra.mxu1 %vm371_vm0, %v2111_v24 }
  0x9e   : > { %vm356_vm8 = vcmp.eq.s32.totalorder %v354_v26, %v312_v12 }
  0x9f   : > { %1663 = vmatmul.msk.f32.gmra.mxu3 %vm371_vm0, %v2114_v27  ;;  %v2121_v28 = vsel %vm356_vm8, 1.0, %v1976_v2 }
  0xa0   : > { %v386_v38 = vpop.f32.mrf.mxu0 }
  0xa1   : > { %v2134_v40 = vadd.f32 %v1849_v36, %v386_v38 }
  0xa5   : > { %1665 = vmatmul.msk.f32.gmra.mxu1 %vm371_vm0, %v2121_v28 }
 0x110   : > { %v444_v29 = vpop.f32.mrf.mxu3 }
 0x111   : > { %v470_v30 = vpop.f32.mrf.mxu2 }
 0x112   : > { %536 = vrot.lane.b32.xlu2 %v470_v30, %s1979_s19  ;;  %v441_v31 = vpop.f32.mrf.mxu1 }
 0x119   : > { %v473_v32 = vpop.f32.mrf.mxu2 }
 0x11a   : > { %538 = vrot.lane.b32.xlu1 %v473_v32, %s1979_s19  ;;  %v499_v34 = vpop.f32.mrf.mxu3  ;;  %v528_v35 = vpop.f32.mrf.mxu1 }
 0x11b   : > { %544 = vrot.lane.b32.xlu2 %v499_v34, %s1980_s20 }
 0x122   : > { %552 = vrot.lane.b32.xlu1 %v528_v35, %s1981_s29  ;;  %v502_v37 = vpop.f32.mrf.mxu3  ;;  %v531_v39 = vpop.f32.mrf.mxu1 }
 0x123   : > { %546 = vrot.lane.b32.xlu0 %v502_v37, %s1980_s20  ;;  %554 = vrot.lane.b32.xlu2 %v531_v39, %s1981_s29 }
 0x12a   : > { %393 = vrot.lane.b32.xlu1 %v2134_v40, %s1979_s19 }
 0x12b   : > { %391 = vrot.lane.b32.xlu0 %v2136_v41, %s1979_s19  ;;  %397 = vrot.lane.b32.xlu2 %v2136_v41, %s1980_s20 }
 0x132   : > { %403 = vrot.lane.b32.xlu1 %v2136_v41, %s1981_s29 }
 0x133   : > { %399 = vrot.lane.b32.xlu0 %v2134_v40, %s1980_s20  ;;  %405 = vrot.lane.b32.xlu2 %v2134_v40, %s1981_s29 }
 0x16c   : > { %v537_v50 = vpop.permute.xlu2 %536 }
 0x16d   : > { %v558_v55 = vsel %vm409_vm9, %v441_v31, %v537_v50 }
 0x175   : > { %v545_v51 = vpop.permute.xlu2 %544 }
 0x176   : > { %v560_v58 = vsel %vm412_vm10, %v558_v55, %v545_v51 }
 0x17d   : > { %v555_v54 = vpop.permute.xlu2 %554 }
 0x185   : > { %v398_v1 = vpop.permute.xlu2 %397 }
 0x18c   : > { %v539_v52 = vpop.permute.xlu1 %538 }
 0x18d   : > { %v559_v56 = vsel %vm409_vm9, %v444_v29, %v539_v52  ;;  %v406_v14 = vpop.permute.xlu2 %405 }
 0x194   : > { %v553_v53 = vpop.permute.xlu1 %552 }
 0x195   : > { %v547_v57 = vpop.permute.xlu0 %546  ;;  %v2203_v60 = vsel %vm415_vm11, %v560_v58, %v553_v53 }
 0x196   : > { %v561_v59 = vsel %vm412_vm10, %v559_v56, %v547_v57 }
 0x197   : > { %v2206_v61 = vsel %vm415_vm11, %v561_v59, %v555_v54 }
 0x198   : > { %v564_v62 = vpack.c.bf16 %v2206_v61, %v2203_v60 }
 0x19a   : > { %621 = vmatmul.bf16.vlgmr.msrb.gmra.mxu2 %v564_v62 }
 0x19c   : > { %v394_v63 = vpop.permute.xlu1 %393 }
 0x19d   : > { %v392_v0 = vpop.permute.xlu0 %391  ;;  %v411_v12 = vsel %vm409_vm9, %v2134_v40, %v394_v63 }
 0x19e   : > { %v410_v3 = vsel %vm409_vm9, %v2136_v41, %v392_v0 }
 0x19f   : > { %v413_v5 = vsel %vm412_vm10, %v410_v3, %v398_v1  ;;  %v2247_v3 = vld [vmem:[%s2495_s4 + $0x18] sm:$0xff] }
 0x1a0   : > { %763 = vmatpush.bf16.msra.mxu3 %v2247_v3 }
 0x1a4   : > { %v404_v4 = vpop.permute.xlu1 %403 }
 0x1a5   : > { %v2214_v6 = vsel %vm415_vm11, %v413_v5, %v404_v4  ;;  %v400_v9 = vpop.permute.xlu0 %399  ;;  %v2253_v4 = vld [vmem:[%s2495_s4 + $0x10] sm:$0xff] }
 0x1a6   : > { %v414_v13 = vsel %vm412_vm10, %v411_v12, %v400_v9  ;;  %764 = vmatpush.bf16.msra.mxu3 %v2253_v4  ;;  %v2259_v9 = vld [vmem:[%s2495_s4 + $0x8] sm:$0xff] }
 0x1a7   : > { %v2221_v17 = vsel %vm415_vm11, %v414_v13, %v406_v14 }
 0x1aa   : > { %765 = vmatpush.bf16.msra.mxu3 %v2259_v9 }
 0x21d   : > { %v622_v7 = vpop.f32.mrf.mxu2 }
 0x21e   : > { %v627_v8 = vadd.f32 %v622_v7, %v2214_v6 }
 0x220   : > { %v1698_v10 = vmul.f32 -1.442695, %v627_v8 }
 0x222   : > { %1850 = vpow2.f32 %v1698_v10 }
 0x225   : > { %v624_v19 = vpop.f32.mrf.mxu2 }
 0x226   : > { %v628_v20 = vadd.f32 %v624_v19, %v2221_v17 }
 0x228   : > { %v1851_v22 = vpop.eup %1850  ;;  %v1699_v25 = vmul.f32 -1.442695, %v628_v20 }
 0x229   : > { %v635_v26 = vadd.f32 1.0, %v1851_v22 }
 0x22a   : > { %1852 = vpow2.f32 %v1699_v25 }
 0x22b   : > { %1854 = vrcp.f32 %v635_v26  ;;  %v648_v34 = vand.u32 2147483648, %v635_v26  ;;  %v646_v36 = vand.u32 2147483647, %v635_v26  ;;  %vm642_vm13 = vweird.f32 %v635_v26 }
 0x22d   : > { %v649_v39 = vor.u32 1.1754944e-38, %v648_v34  ;;  %vm647_vm15 = vcmp.eq.f32.partialorder %v646_v36, 8.507059e+37  ;;  %v2268_v36 = vld [vmem:[%s2495_s4] sm:$0xff] }
 0x22e   : > { %766 = vmatpush.bf16.msra.mxu3 %v2268_v36 }
 0x230   : > { %v1853_v29 = vpop.eup %1852 }
 0x231   : > { %v1855_v30 = vpop.eup %1854  ;;  %v636_v31 = vadd.f32 1.0, %v1853_v29 }
 0x232   : > { %v638_v32 = vmul.f32 %v1855_v30, %v635_v26  ;;  %vm643_vm12 = vweird.f32 %v1855_v30 }
 0x233   : > { %1856 = vrcp.f32 %v636_v31  ;;  %vm644_vm14 = vmor %vm642_vm13, %vm643_vm12  ;;  %v663_v55 = vand.u32 2147483648, %v636_v31  ;;  %v661_v57 = vand.u32 2147483647, %v636_v31  ;;  %vm657_vm2 = vweird.f32 %v636_v31 }
 0x234   : > { %v639_v33 = vsub.f32 1.0, %v638_v32 }
 0x235   : > { %v664_v59 = vor.u32 1.1754944e-38, %v663_v55  ;;  %vm662_vm4 = vcmp.eq.f32.partialorder %v661_v57, 8.507059e+37 }
 0x236   : > { %v640_v35 = vmul.f32 %v1855_v30, %v639_v33 }
 0x238   : > { %v641_v37 = vadd.f32 %v1855_v30, %v640_v35 }
 0x239   : > { %v1857_v38 = vpop.eup %1856 }
 0x23a   : > { %v653_v50 = vmul.f32 %v1857_v38, %v636_v31  ;;  %v645_v51 = vsel %vm644_vm14, %v1855_v30, %v641_v37  ;;  %vm658_vm1 = vweird.f32 %v1857_v38 }
 0x23b   : > { %v650_v52 = vsel %vm647_vm15, %v649_v39, %v645_v51  ;;  %vm659_vm3 = vmor %vm657_vm2, %vm658_vm1 }
 0x23c   : > { %v654_v53 = vsub.f32 1.0, %v653_v50  ;;  %v667_v54 = vmul.f32 %v650_v52, %v2203_v60 }
 0x23e   : > { %697 = vrot.lane.b32.xlu2 %v667_v54, %s1980_s20  ;;  %681 = vrot.lane.b32.xlu0 %v667_v54, %s1981_s29  ;;  %v655_v56 = vmul.f32 %v1857_v38, %v654_v53 }
 0x240   : > { %v656_v58 = vadd.f32 %v1857_v38, %v655_v56 }
 0x242   : > { %v660_v62 = vsel %vm659_vm3, %v1857_v38, %v656_v58 }
 0x243   : > { %v665_v63 = vsel %vm662_vm4, %v664_v59, %v660_v62 }
 0x244   : > { %v668_v0 = vmul.f32 %v665_v63, %v2206_v61 }
 0x246   : > { %715 = vrot.lane.b32.xlu2 %v668_v0, %s1979_s19  ;;  %699 = vrot.lane.b32.xlu0 %v668_v0, %s1980_s20 }
 0x247   : > { %683 = vrot.lane.b32.xlu1 %v668_v0, %s1981_s29 }
 0x24e   : > { %689 = vrot.lane.b32.xlu2 %v2203_v60, %s1980_s20  ;;  %671 = vrot.lane.b32.xlu0 %v2203_v60, %s1981_s29 }
 0x24f   : > { %713 = vrot.lane.b32.xlu1 %v667_v54, %s1979_s19 }
 0x256   : > { %707 = vrot.lane.b32.xlu2 %v2206_v61, %s1979_s19  ;;  %691 = vrot.lane.b32.xlu0 %v2206_v61, %s1980_s20 }
 0x257   : > { %673 = vrot.lane.b32.xlu1 %v2206_v61, %s1981_s29 }
 0x25f   : > { %705 = vrot.lane.b32.xlu1 %v2203_v60, %s1979_s19 }
 0x298   : > { %v698_v5 = vpop.permute.xlu2 %697 }
 0x2a0   : > { %v716_v19 = vpop.permute.xlu2 %715 }
 0x2a8   : > { %v690_v32 = vpop.permute.xlu2 %689 }
 0x2b0   : > { %v682_v1 = vpop.permute.xlu0 %681  ;;  %v708_v50 = vpop.permute.xlu2 %707 }
 0x2b1   : > { %v687_v10 = vadd.f32 %v682_v1, %v667_v54 }
 0x2b3   : > { %v703_v14 = vadd.f32 %v698_v5, %v687_v10 }
 0x2b8   : > { %v700_v12 = vpop.permute.xlu0 %699 }
 0x2b9   : > { %v684_v7 = vpop.permute.xlu1 %683 }
 0x2ba   : > { %v688_v8 = vadd.f32 %v684_v7, %v668_v0 }
 0x2bc   : > { %v704_v13 = vadd.f32 %v700_v12, %v688_v8 }
 0x2be   : > { %v720_v22 = vadd.f32 %v716_v19, %v704_v13 }
 0x2c0   : > { %v672_v29 = vpop.permute.xlu0 %671 }
 0x2c1   : > { %v714_v20 = vpop.permute.xlu1 %713  ;;  %v677_v31 = vadd.f32 %v672_v29, %v2203_v60 }
 0x2c2   : > { %v719_v25 = vadd.f32 %v714_v20, %v703_v14 }
 0x2c3   : > { %v695_v33 = vadd.f32 %v690_v32, %v677_v31 }
 0x2c4   : > { %v1823_v26 = vpack.i.bf16 %v720_v22, %v719_v25 }
 0x2c6   : > { %1824 = vrot.lane.b32.xlu0 %v1823_v26, %s1979_s19 }
 0x2c8   : > { %v692_v37 = vpop.permute.xlu0 %691 }
 0x2c9   : > { %v674_v30 = vpop.permute.xlu1 %673 }
 0x2ca   : > { %v678_v38 = vadd.f32 %v674_v30, %v2206_v61 }
 0x2cc   : > { %v696_v39 = vadd.f32 %v692_v37, %v678_v38 }
 0x2ce   : > { %v712_v60 = vadd.f32 %v708_v50, %v696_v39 }
 0x2d1   : > { %v706_v34 = vpop.permute.xlu1 %705 }
 0x2d2   : > { %v711_v35 = vadd.f32 %v706_v34, %v695_v33 }
 0x2d4   : > { %827 = vrot.lane.b32.xlu0 %v711_v35, %s1979_s19 }
 0x338   : > { %v1825_v51 = vpop.permute.xlu0 %1824 }
 0x339   : > { %v1827_v52 = vunpack.i.h.bf16 %v1825_v51  ;;  %v1826_v53 = vunpack.i.l.bf16 %v1825_v51 }
 0x33b   : > { %v730_v54 = vsel %vm409_vm9, %v712_v60, %v1827_v52  ;;  %v729_v55 = vsel %vm409_vm9, %v711_v35, %v1826_v53 }
 0x33c   : > { %v731_v56 = vpack.c.bf16 %v730_v54, %v729_v55  ;;  %v303_v54 = vshrl.u32 %v302_v11, 7 }
 0x33e   : > { %1716 = vmatmul.msk.bf16.vlgmr.msra.gmra.mxu3 %vm412_vm10, %v731_v56  ;;  %vm305_vm1 = vcmp.ne.s32.totalorder %v303_v54, 0 }
 0x3c1   : > { %v768_v57 = vpop.f32.mrf.mxu3 }
 0x3c2   : > { %775 = vrot.lane.b32.xlu1 %v768_v57, %s1979_s19 }
 0x3c9   : > { %v770_v58 = vpop.f32.mrf.mxu3 }
 0x3ca   : > { %829 = vrot.lane.b32.xlu1 %v712_v60, %s1979_s19  ;;  %777 = vrot.lane.b32.xlu2 %v770_v58, %s1979_s19  ;;  %v828_v60 = vpop.permute.xlu0 %827 }
 0x424   : > { %v778_v61 = vpop.permute.xlu2 %777 }
 0x425   : > { %v782_v59 = vadd.f32 %v778_v61, %v2134_v40 }
 0x427   : > { %1858 = vtanh.f32 %v782_v59  ;;  %v1718_v7 = vmul.f32 -1.442695, %v782_v59 }
 0x42d   : > { %v1859_v62 = vpop.eup %1858 }
 0x42e   : > { %839 = vrot.lane.b32.xlu0 %v1859_v62, %s1981_s29 }
 0x434   : > { %v776_v63 = vpop.permute.xlu1 %775 }
 0x435   : > { %v781_v0 = vadd.f32 %v776_v63, %v2136_v41  ;;  %v2284_v63 = vsel %vm305_vm1, 1.0, %v1976_v2 }
 0x437   : > { %1860 = vtanh.f32 %v781_v0  ;;  %v1717_v5 = vmul.f32 -1.442695, %v781_v0 }
 0x439   : > { %1862 = vpow2.f32 %v1717_v5 }
 0x43a   : > { %1864 = vpow2.f32 %v1718_v7 }
 0x43c   : > { %v830_v62 = vpop.permute.xlu1 %829 }
 0x43d   : > { %v1861_v1 = vpop.eup %1860 }
 0x43e   : > { %837 = vrot.lane.b32.xlu2 %v1861_v1, %s1981_s29 }
 0x43f   : > { %v1863_v8 = vpop.eup %1862 }
 0x440   : > { %v789_v10 = vadd.f32 1.0, %v1863_v8  ;;  %v1865_v12 = vpop.eup %1864 }
 0x441   : > { %v790_v13 = vadd.f32 1.0, %v1865_v12 }
 0x442   : > { %1866 = vrcp.f32 %v789_v10  ;;  %v802_v32 = vand.u32 2147483648, %v789_v10  ;;  %vm796_vm6 = vweird.f32 %v789_v10  ;;  %v800_v33 = vand.u32 2147483647, %v789_v10 }
 0x443   : > { %1868 = vrcp.f32 %v790_v13  ;;  %v817_v37 = vand.u32 2147483648, %v790_v13  ;;  %vm811_vm12 = vweird.f32 %v790_v13  ;;  %v815_v39 = vand.u32 2147483647, %v790_v13 }
 0x444   : > { %v803_v38 = vor.u32 1.1754944e-38, %v802_v32  ;;  %vm801_vm13 = vcmp.eq.f32.partialorder %v800_v33, 8.507059e+37 }
 0x445   : > { %v818_v52 = vor.u32 1.1754944e-38, %v817_v37  ;;  %vm816_vm15 = vcmp.eq.f32.partialorder %v815_v39, 8.507059e+37 }
 0x448   : > { %v1867_v14 = vpop.eup %1866 }
 0x449   : > { %v792_v19 = vmul.f32 %v1867_v14, %v789_v10  ;;  %v1869_v20 = vpop.eup %1868  ;;  %vm797_vm5 = vweird.f32 %v1867_v14 }
 0x44a   : > { %v807_v22 = vmul.f32 %v1869_v20, %v790_v13  ;;  %vm798_vm7 = vmor %vm796_vm6, %vm797_vm5  ;;  %vm812_vm8 = vweird.f32 %v1869_v20 }
 0x44b   : > { %v793_v25 = vsub.f32 1.0, %v792_v19  ;;  %vm813_vm14 = vmor %vm811_vm12, %vm812_vm8 }
 0x44c   : > { %v808_v26 = vsub.f32 1.0, %v807_v22 }
 0x44d   : > { %v794_v29 = vmul.f32 %v1867_v14, %v793_v25 }
 0x44e   : > { %v809_v30 = vmul.f32 %v1869_v20, %v808_v26 }
 0x44f   : > { %v795_v31 = vadd.f32 %v1867_v14, %v794_v29 }
 0x450   : > { %v810_v34 = vadd.f32 %v1869_v20, %v809_v30 }
 0x451   : > { %v799_v35 = vsel %vm798_vm7, %v1867_v14, %v795_v31 }
 0x452   : > { %v804_v50 = vsel %vm801_vm13, %v803_v38, %v799_v35  ;;  %v814_v51 = vsel %vm813_vm14, %v1869_v20, %v810_v34 }
 0x453   : > { %v823_v55 = vsub.f32 1.0, %v804_v50  ;;  %v819_v56 = vsel %vm816_vm15, %v818_v52, %v814_v51 }
 0x454   : > { %v824_v58 = vsub.f32 1.0, %v819_v56 }
 0x455   : > { %v833_v61 = vmul.f32 %v828_v60, %v823_v55 }
 0x456   : > { %v834_v1 = vmul.f32 %v830_v62, %v824_v58 }
 0x498   : > { %v838_v53 = vpop.permute.xlu2 %837 }
 0x499   : > { %v843_v57 = vmul.f32 %v838_v53, %v804_v50 }
 0x49b   : > { %v845_v59 = vadd.f32 %v843_v57, %v833_v61 }
 0x49d   : > { %v847_v7 = vmul.f32 %v2284_v63, %v845_v59 }
 0x4a0   : > { %v840_v0 = vpop.permute.xlu0 %839 }
 0x4a1   : > { %v844_v5 = vmul.f32 %v840_v0, %v819_v56 }
 0x4a3   : > { %v846_v8 = vadd.f32 %v844_v5, %v834_v1 }
 0x4a5   : > { %v1828_v10 = vpack.i.bf16 %v847_v7, %v846_v8 }
 0x4a7   : > { %1829 = vrot.lane.b32.xlu1 %v1828_v10, %s1981_s29 }
 0x519   : > { %v1830_v11 = vpop.permute.xlu1 %1829 }
 0x51a   : > { %v1831_v12 = vunpack.i.l.bf16 %v1830_v11  ;;  %v1832_v13 = vunpack.i.h.bf16 %v1830_v11 }
 0x51c   : > { %871 = vmatpush.msra.mxu2 %v1831_v12  ;;  %894 = vmatpush.msra.mxu1 %v1831_v12 }
 0x51d   : > { %917 = vmatpush.msrb.mxu3 %v1831_v12  ;;  %940 = vmatpush.msrb.mxu0 %v1831_v12 }
 0x51e   : > { %872 = vmatpush.msra.mxu2 %v1832_v13  ;;  %895 = vmatpush.msra.mxu1 %v1832_v13 }
 0x51f   : > { %918 = vmatpush.msrb.mxu3 %v1832_v13  ;;  %941 = vmatpush.msrb.mxu0 %v1832_v13 }
 0x520   : > { %1719 = vmatmul.msk.f32.vlgmr.msra.gmra.mxu2 %vm371_vm0, %v2099_v21  ;;  %1721 = vmatmul.msk.f32.vlgmr.msra.gmra.mxu1 %vm371_vm0, %v2089_v16 }
 0x521   : > { %1723 = vmatmul.msk.f32.vlgmr.msrb.gmra.mxu3 %vm371_vm0, %v2102_v23  ;;  %1725 = vmatmul.msk.f32.vlgmr.msrb.gmra.mxu0 %vm371_vm0, %v2111_v24 }
 0x522   : > { %980 = vmatpush.bf16.msrb.mxu1 %v2153_v42  ;;  %1106 = vmatpush.bf16.msrb.mxu2 %v2247_v3 }
 0x526   : > { %981 = vmatpush.bf16.msrb.mxu1 %v2159_v43  ;;  %1107 = vmatpush.bf16.msrb.mxu2 %v2253_v4 }
 0x528   : > { %1720 = vmatmul.msk.f32.gmra.mxu2 %vm371_vm0, %v2086_v15  ;;  %1722 = vmatmul.msk.f32.gmra.mxu1 %vm371_vm0, %v2096_v18 }
 0x529   : > { %1724 = vmatmul.msk.f32.gmra.mxu3 %vm371_vm0, %v2114_v27  ;;  %1726 = vmatmul.msk.f32.gmra.mxu0 %vm371_vm0, %v2121_v28 }
 0x52a   : > { %982 = vmatpush.bf16.msrb.mxu1 %v2165_v44  ;;  %1108 = vmatpush.bf16.msrb.mxu2 %v2259_v9 }
 0x52e   : > { %983 = vmatpush.bf16.msrb.mxu1 %v2171_v45  ;;  %1109 = vmatpush.bf16.msrb.mxu2 %v2268_v36 }
 0x532   : > { %984 = vmatpush.bf16.msrb.mxu1 %v2177_v46 }
 0x536   : > { %985 = vmatpush.bf16.msrb.mxu1 %v2183_v47 }
 0x53a   : > { %986 = vmatpush.bf16.msrb.mxu1 %v2189_v48 }
 0x53e   : > { %987 = vmatpush.bf16.msrb.mxu1 %v2195_v49 }
 0x542   : > { %1449 = vmatpush.bf16.msra.mxu1 %v2247_v3 }
 0x546   : > { %1450 = vmatpush.bf16.msra.mxu1 %v2253_v4 }
 0x54a   : > { %1451 = vmatpush.bf16.msra.mxu1 %v2259_v9 }
 0x54e   : > { %1452 = vmatpush.bf16.msra.mxu1 %v2268_v36 }
 0x59d   : > { %v897_v2 = vpop.f32.mrf.mxu1 }
 0x59e   : > { %951 = vrot.lane.b32.xlu2 %v897_v2, %s1979_s19  ;;  %v943_v14 = vpop.f32.mrf.mxu0 }
 0x5a3   : > { %v874_v3 = vpop.f32.mrf.mxu2 }
 0x5a4   : > { %v920_v19 = vpop.f32.mrf.mxu3 }
 0x5a5   : > { %959 = vrot.lane.b32.xlu1 %v920_v19, %s1980_s20  ;;  %v900_v20 = vpop.f32.mrf.mxu1 }
 0x5a6   : > { %953 = vrot.lane.b32.xlu0 %v900_v20, %s1979_s19  ;;  %v946_v22 = vpop.f32.mrf.mxu0 }
 0x5ab   : > { %v877_v26 = vpop.f32.mrf.mxu2 }
 0x5ac   : > { %v923_v25 = vpop.f32.mrf.mxu3 }
 0x5ad   : > { %969 = vrot.lane.b32.xlu1 %v946_v22, %s1981_s29  ;;  %961 = vrot.lane.b32.xlu2 %v923_v25, %s1980_s20 }
 0x5ae   : > { %967 = vrot.lane.b32.xlu0 %v943_v14, %s1981_s29 }
 0x5f8   : > { %v952_v4 = vpop.permute.xlu2 %951 }
 0x5f9   : > { %v973_v30 = vsel %vm409_vm9, %v874_v3, %v952_v4 }
 0x607   : > { %v962_v31 = vpop.permute.xlu2 %961 }
 0x617   : > { %v960_v9 = vpop.permute.xlu1 %959 }
 0x618   : > { %v954_v36 = vpop.permute.xlu0 %953  ;;  %v975_v33 = vsel %vm412_vm10, %v973_v30, %v960_v9 }
 0x619   : > { %v974_v29 = vsel %vm409_vm9, %v877_v26, %v954_v36 }
 0x61a   : > { %v976_v34 = vsel %vm412_vm10, %v974_v29, %v962_v31 }
 0x61f   : > { %v970_v32 = vpop.permute.xlu1 %969 }
 0x620   : > { %v968_v35 = vpop.permute.xlu0 %967  ;;  %v2331_v37 = vsel %vm415_vm11, %v976_v34, %v970_v32 }
 0x621   : > { %v2334_v38 = vsel %vm415_vm11, %v975_v33, %v968_v35 }
 0x622   : > { %v979_v39 = vpack.c.bf16 %v2331_v37, %v2334_v38 }
 0x624   : > { %988 = vmatmul.bf16.vlgmr.msrb.gmra.mxu1 %v979_v39 }
 0x6a1   : > { %v989_v50 = vpop.f32.mrf.mxu1 }
 0x6a2   : > { %v994_v51 = vadd.f32 %v989_v50, %v2214_v6 }
 0x6a4   : > { %v1727_v60 = vmul.f32 -1.442695, %v994_v51 }
 0x6a6   : > { %1870 = vpow2.f32 %v1727_v60 }
 0x6a9   : > { %v991_v52 = vpop.f32.mrf.mxu1 }
 0x6aa   : > { %v995_v53 = vadd.f32 %v991_v52, %v2221_v17 }
 0x6ac   : > { %v1871_v54 = vpop.eup %1870  ;;  %v1728_v55 = vmul.f32 -1.442695, %v995_v53 }
 0x6ad   : > { %v1002_v56 = vadd.f32 1.0, %v1871_v54 }
 0x6ae   : > { %1872 = vpow2.f32 %v1728_v55 }
 0x6af   : > { %1874 = vrcp.f32 %v1002_v56  ;;  %v1015_v0 = vand.u32 2147483648, %v1002_v56  ;;  %v1013_v5 = vand.u32 2147483647, %v1002_v56  ;;  %vm1009_vm3 = vweird.f32 %v1002_v56 }
 0x6b1   : > { %v1016_v10 = vor.u32 1.1754944e-38, %v1015_v0  ;;  %vm1014_vm5 = vcmp.eq.f32.partialorder %v1013_v5, 8.507059e+37 }
 0x6b4   : > { %v1873_v57 = vpop.eup %1872 }
 0x6b5   : > { %v1875_v58 = vpop.eup %1874  ;;  %v1003_v61 = vadd.f32 1.0, %v1873_v57 }
 0x6b6   : > { %v1005_v59 = vmul.f32 %v1875_v58, %v1002_v56  ;;  %vm1010_vm2 = vweird.f32 %v1875_v58 }
 0x6b7   : > { %1876 = vrcp.f32 %v1003_v61  ;;  %vm1011_vm4 = vmor %vm1009_vm3, %vm1010_vm2  ;;  %v1030_v19 = vand.u32 2147483648, %v1003_v61  ;;  %v1028_v22 = vand.u32 2147483647, %v1003_v61  ;;  %vm1024_vm7 = vweird.f32 %v1003_v61 }
 0x6b8   : > { %v1006_v62 = vsub.f32 1.0, %v1005_v59 }
 0x6b9   : > { %v1031_v3 = vor.u32 1.1754944e-38, %v1030_v19  ;;  %vm1029_vm12 = vcmp.eq.f32.partialorder %v1028_v22, 8.507059e+37 }
 0x6ba   : > { %v1007_v1 = vmul.f32 %v1875_v58, %v1006_v62 }
 0x6bc   : > { %v1008_v7 = vadd.f32 %v1875_v58, %v1007_v1 }
 0x6bd   : > { %v1877_v8 = vpop.eup %1876 }
 0x6be   : > { %v1020_v11 = vmul.f32 %v1877_v8, %v1003_v61  ;;  %v1012_v12 = vsel %vm1011_vm4, %v1875_v58, %v1008_v7  ;;  %vm1025_vm6 = vweird.f32 %v1877_v8 }
 0x6bf   : > { %v1017_v13 = vsel %vm1014_vm5, %v1016_v10, %v1012_v12  ;;  %vm1026_vm8 = vmor %vm1024_vm7, %vm1025_vm6 }
 0x6c0   : > { %v1021_v2 = vsub.f32 1.0, %v1020_v11  ;;  %v1034_v14 = vmul.f32 %v1017_v13, %v2334_v38 }
 0x6c2   : > { %1064 = vrot.lane.b32.xlu1 %v1034_v14, %s1980_s20  ;;  %1048 = vrot.lane.b32.xlu2 %v1034_v14, %s1981_s29  ;;  %v1022_v20 = vmul.f32 %v1877_v8, %v1021_v2 }
 0x6c4   : > { %v1023_v25 = vadd.f32 %v1877_v8, %v1022_v20 }
 0x6c6   : > { %v1027_v4 = vsel %vm1026_vm8, %v1877_v8, %v1023_v25 }
 0x6c7   : > { %v1032_v9 = vsel %vm1029_vm12, %v1031_v3, %v1027_v4 }
 0x6c8   : > { %v1035_v36 = vmul.f32 %v1032_v9, %v2331_v37 }
 0x6ca   : > { %1082 = vrot.lane.b32.xlu1 %v1035_v36, %s1979_s19  ;;  %1066 = vrot.lane.b32.xlu2 %v1035_v36, %s1980_s20 }
 0x6cb   : > { %1050 = vrot.lane.b32.xlu0 %v1035_v36, %s1981_s29 }
 0x6d2   : > { %1056 = vrot.lane.b32.xlu1 %v2334_v38, %s1980_s20  ;;  %1038 = vrot.lane.b32.xlu2 %v2334_v38, %s1981_s29 }
 0x6d3   : > { %1080 = vrot.lane.b32.xlu0 %v1034_v14, %s1979_s19 }
 0x6da   : > { %1074 = vrot.lane.b32.xlu1 %v2331_v37, %s1979_s19  ;;  %1058 = vrot.lane.b32.xlu2 %v2331_v37, %s1980_s20 }
 0x6db   : > { %1040 = vrot.lane.b32.xlu0 %v2331_v37, %s1981_s29 }
 0x6e3   : > { %1072 = vrot.lane.b32.xlu0 %v2334_v38, %s1979_s19 }
 0x71c   : > { %v1049_v26 = vpop.permute.xlu2 %1048 }
 0x71d   : > { %v1054_v33 = vadd.f32 %v1049_v26, %v1034_v14 }
 0x724   : > { %v1067_v32 = vpop.permute.xlu2 %1066 }
 0x72c   : > { %v1039_v54 = vpop.permute.xlu2 %1038 }
 0x72d   : > { %v1044_v56 = vadd.f32 %v1039_v54, %v2334_v38 }
 0x734   : > { %v1065_v29 = vpop.permute.xlu1 %1064  ;;  %v1059_v59 = vpop.permute.xlu2 %1058 }
 0x735   : > { %v1070_v35 = vadd.f32 %v1065_v29, %v1054_v33 }
 0x73c   : > { %v1083_v39 = vpop.permute.xlu1 %1082 }
 0x73d   : > { %v1051_v30 = vpop.permute.xlu0 %1050 }
 0x73e   : > { %v1055_v31 = vadd.f32 %v1051_v30, %v1035_v36 }
 0x740   : > { %v1071_v34 = vadd.f32 %v1067_v32, %v1055_v31 }
 0x742   : > { %v1087_v51 = vadd.f32 %v1083_v39, %v1071_v34 }
 0x744   : > { %v1057_v55 = vpop.permute.xlu1 %1056 }
 0x745   : > { %v1081_v50 = vpop.permute.xlu0 %1080  ;;  %v1062_v57 = vadd.f32 %v1057_v55, %v1044_v56 }
 0x746   : > { %v1086_v60 = vadd.f32 %v1081_v50, %v1070_v35 }
 0x748   : > { %v1833_v52 = vpack.i.bf16 %v1087_v51, %v1086_v60 }
 0x74a   : > { %1834 = vrot.lane.b32.xlu2 %v1833_v52, %s1979_s19 }
 0x74c   : > { %v1075_v1 = vpop.permute.xlu1 %1074 }
 0x74d   : > { %v1041_v53 = vpop.permute.xlu0 %1040 }
 0x74e   : > { %v1045_v62 = vadd.f32 %v1041_v53, %v2331_v37 }
 0x750   : > { %v1063_v0 = vadd.f32 %v1059_v59, %v1045_v62 }
 0x752   : > { %v1079_v7 = vadd.f32 %v1075_v1, %v1063_v0 }
 0x755   : > { %v1073_v58 = vpop.permute.xlu0 %1072 }
 0x756   : > { %v1078_v61 = vadd.f32 %v1073_v58, %v1062_v57 }
 0x758   : > { %1170 = vrot.lane.b32.xlu2 %v1078_v61, %s1979_s19 }
 0x7a4   : > { %v1835_v5 = vpop.permute.xlu2 %1834 }
 0x7a5   : > { %v1837_v8 = vunpack.i.h.bf16 %v1835_v5  ;;  %v1836_v10 = vunpack.i.l.bf16 %v1835_v5 }
 0x7a7   : > { %v1096_v11 = vsel %vm409_vm9, %v1078_v61, %v1836_v10  ;;  %v1097_v12 = vsel %vm409_vm9, %v1079_v7, %v1837_v8 }
 0x7a8   : > { %v1098_v13 = vpack.c.bf16 %v1097_v12, %v1096_v11 }
 0x7aa   : > { %1729 = vmatmul.msk.bf16.vlgmr.msrb.gmra.mxu2 %vm412_vm10, %v1098_v13 }
 0x7b2   : > { %v1171_v54 = vpop.permute.xlu2 %1170 }
 0x82d   : > { %v1111_v38 = vpop.f32.mrf.mxu2 }
 0x82e   : > { %1118 = vrot.lane.b32.xlu0 %v1111_v38, %s1979_s19 }
 0x835   : > { %v1113_v2 = vpop.f32.mrf.mxu2 }
 0x836   : > { %1172 = vrot.lane.b32.xlu0 %v1079_v7, %s1979_s19  ;;  %1120 = vrot.lane.b32.xlu1 %v1113_v2, %s1979_s19 }
 0x8a0   : > { %v1119_v37 = vpop.permute.xlu0 %1118 }
 0x8a1   : > { %v1124_v14 = vadd.f32 %v1119_v37, %v2136_v41 }
 0x8a3   : > { %1878 = vtanh.f32 %v1124_v14  ;;  %v1730_v3 = vmul.f32 -1.442695, %v1124_v14 }
 0x8a8   : > { %v1121_v19 = vpop.permute.xlu1 %1120  ;;  %v1173_v13 = vpop.permute.xlu0 %1172 }
 0x8a9   : > { %v1879_v20 = vpop.eup %1878  ;;  %v1125_v22 = vadd.f32 %v1121_v19, %v2134_v40 }
 0x8aa   : > { %1180 = vrot.lane.b32.xlu1 %v1879_v20, %s1981_s29 }
 0x8ab   : > { %1880 = vtanh.f32 %v1125_v22  ;;  %v1731_v4 = vmul.f32 -1.442695, %v1125_v22 }
 0x8ac   : > { %1882 = vpow2.f32 %v1730_v3 }
 0x8ad   : > { %1884 = vpow2.f32 %v1731_v4 }
 0x8b1   : > { %v1881_v25 = vpop.eup %1880 }
 0x8b2   : > { %1182 = vrot.lane.b32.xlu2 %v1881_v25, %s1981_s29  ;;  %v1883_v9 = vpop.eup %1882 }
 0x8b3   : > { %v1885_v36 = vpop.eup %1884  ;;  %v1132_v26 = vadd.f32 1.0, %v1883_v9 }
 0x8b4   : > { %v1133_v29 = vadd.f32 1.0, %v1885_v36 }
 0x8b5   : > { %1886 = vrcp.f32 %v1132_v26  ;;  %v1145_v60 = vand.u32 2147483648, %v1132_v26  ;;  %vm1139_vm15 = vweird.f32 %v1132_v26  ;;  %v1143_v53 = vand.u32 2147483647, %v1132_v26 }
 0x8b6   : > { %1888 = vrcp.f32 %v1133_v29  ;;  %v1160_v55 = vand.u32 2147483648, %v1133_v29  ;;  %vm1154_vm2 = vweird.f32 %v1133_v29  ;;  %v1158_v56 = vand.u32 2147483647, %v1133_v29 }
 0x8b7   : > { %v1146_v58 = vor.u32 1.1754944e-38, %v1145_v60  ;;  %vm1144_vm4 = vcmp.eq.f32.partialorder %v1143_v53, 8.507059e+37 }
 0x8b8   : > { %v1161_v59 = vor.u32 1.1754944e-38, %v1160_v55  ;;  %vm1159_vm5 = vcmp.eq.f32.partialorder %v1158_v56, 8.507059e+37 }
 0x8bb   : > { %v1887_v30 = vpop.eup %1886 }
 0x8bc   : > { %v1889_v31 = vpop.eup %1888  ;;  %v1135_v32 = vmul.f32 %v1887_v30, %v1132_v26  ;;  %vm1140_vm13 = vweird.f32 %v1887_v30 }
 0x8bd   : > { %v1150_v33 = vmul.f32 %v1889_v31, %v1133_v29  ;;  %vm1155_vm14 = vweird.f32 %v1889_v31  ;;  %vm1141_vm1 = vmor %vm1139_vm15, %vm1140_vm13 }
 0x8be   : > { %v1136_v34 = vsub.f32 1.0, %v1135_v32  ;;  %vm1156_vm3 = vmor %vm1154_vm2, %vm1155_vm14 }
 0x8bf   : > { %v1151_v35 = vsub.f32 1.0, %v1150_v33 }
 0x8c0   : > { %v1137_v39 = vmul.f32 %v1887_v30, %v1136_v34 }
 0x8c1   : > { %v1152_v50 = vmul.f32 %v1889_v31, %v1151_v35 }
 0x8c2   : > { %v1138_v51 = vadd.f32 %v1887_v30, %v1137_v39 }
 0x8c3   : > { %v1153_v52 = vadd.f32 %v1889_v31, %v1152_v50 }
 0x8c4   : > { %v1142_v57 = vsel %vm1141_vm1, %v1887_v30, %v1138_v51 }
 0x8c5   : > { %v1157_v61 = vsel %vm1156_vm3, %v1889_v31, %v1153_v52  ;;  %v1147_v62 = vsel %vm1144_vm4, %v1146_v58, %v1142_v57 }
 0x8c6   : > { %v1162_v0 = vsel %vm1159_vm5, %v1161_v59, %v1157_v61  ;;  %v1166_v1 = vsub.f32 1.0, %v1147_v62 }
 0x8c7   : > { %v1167_v7 = vsub.f32 1.0, %v1162_v0 }
 0x8c8   : > { %v1176_v11 = vmul.f32 %v1171_v54, %v1166_v1 }
 0x8c9   : > { %v1177_v38 = vmul.f32 %v1173_v13, %v1167_v7 }
 0x90c   : > { %v1183_v5 = vpop.permute.xlu2 %1182 }
 0x90d   : > { %v1187_v10 = vmul.f32 %v1183_v5, %v1162_v0 }
 0x90f   : > { %v1189_v37 = vadd.f32 %v1187_v10, %v1177_v38 }
 0x91c   : > { %v1181_v8 = vpop.permute.xlu1 %1180 }
 0x91d   : > { %v1186_v12 = vmul.f32 %v1181_v8, %v1147_v62 }
 0x91f   : > { %v1188_v2 = vadd.f32 %v1186_v12, %v1176_v11 }
 0x921   : > { %v1190_v14 = vmul.f32 %v2284_v63, %v1188_v2 }
 0x923   : > { %v1838_v19 = vpack.i.bf16 %v1190_v14, %v1189_v37 }
 0x925   : > { %1839 = vrot.lane.b32.xlu0 %v1838_v19, %s1981_s29 }
 0x997   : > { %v1840_v20 = vpop.permute.xlu0 %1839 }
 0x998   : > { %v1841_v22 = vunpack.i.l.bf16 %v1840_v20  ;;  %v1842_v25 = vunpack.i.h.bf16 %v1840_v20 }
 0x99a   : > { %1214 = vmatpush.msra.mxu3 %v1841_v22  ;;  %1237 = vmatpush.msra.mxu0 %v1841_v22 }
 0x99b   : > { %1260 = vmatpush.msra.mxu2 %v1841_v22 }
 0x99c   : > { %1215 = vmatpush.msra.mxu3 %v1842_v25  ;;  %1238 = vmatpush.msra.mxu0 %v1842_v25 }
 0x99d   : > { %1261 = vmatpush.msra.mxu2 %v1842_v25  ;;  %1732 = vmatmul.msk.f32.vlgmr.msra.gmra.mxu3 %vm371_vm0, %v2099_v21 }
 0x99e   : > { %1734 = vmatmul.msk.f32.vlgmr.msra.gmra.mxu0 %vm371_vm0, %v2089_v16  ;;  %1736 = vmatmul.msk.f32.vlgmr.msra.gmra.mxu2 %vm371_vm0, %v2102_v23 }
 0x99f   : > { %1283 = vmatpush.msrb.mxu3 %v1841_v22  ;;  %1323 = vmatpush.bf16.msrb.mxu0 %v2153_v42 }
 0x9a1   : > { %1284 = vmatpush.msrb.mxu3 %v1842_v25 }
 0x9a3   : > { %1324 = vmatpush.bf16.msrb.mxu0 %v2159_v43 }
 0x9a5   : > { %1733 = vmatmul.msk.f32.gmra.mxu3 %vm371_vm0, %v2086_v15 }
 0x9a6   : > { %1735 = vmatmul.msk.f32.gmra.mxu0 %vm371_vm0, %v2096_v18  ;;  %1737 = vmatmul.msk.f32.gmra.mxu2 %vm371_vm0, %v2114_v27 }
 0x9a7   : > { %1325 = vmatpush.bf16.msrb.mxu0 %v2165_v44 }
 0x9ab   : > { %1326 = vmatpush.bf16.msrb.mxu0 %v2171_v45 }
 0x9ad   : > { %1738 = vmatmul.msk.f32.vlgmr.msrb.gmra.mxu3 %vm371_vm0, %v2111_v24 }
 0x9af   : > { %1327 = vmatpush.bf16.msrb.mxu0 %v2177_v46 }
 0x9b3   : > { %1328 = vmatpush.bf16.msrb.mxu0 %v2183_v47 }
 0x9b5   : > { %1739 = vmatmul.msk.f32.gmra.mxu3 %vm371_vm0, %v2121_v28 }
 0x9b7   : > { %1329 = vmatpush.bf16.msrb.mxu0 %v2189_v48 }
 0x9bb   : > { %1330 = vmatpush.bf16.msrb.mxu0 %v2195_v49 }
 0xa1b   : > { %v1240_v15 = vpop.f32.mrf.mxu0 }
 0xa1c   : > { %1294 = vrot.lane.b32.xlu1 %v1240_v15, %s1979_s19 }
 0xa20   : > { %v1217_v16 = vpop.f32.mrf.mxu3 }
 0xa21   : > { %v1263_v18 = vpop.f32.mrf.mxu2 }
 0xa22   : > { %1302 = vrot.lane.b32.xlu0 %v1263_v18, %s1980_s20 }
 0xa23   : > { %v1243_v21 = vpop.f32.mrf.mxu0 }
 0xa24   : > { %1296 = vrot.lane.b32.xlu2 %v1243_v21, %s1979_s19 }
 0xa28   : > { %v1220_v23 = vpop.f32.mrf.mxu3 }
 0xa29   : > { %v1266_v24 = vpop.f32.mrf.mxu2 }
 0xa2a   : > { %1304 = vrot.lane.b32.xlu1 %v1266_v24, %s1980_s20 }
 0xa30   : > { %v1286_v27 = vpop.f32.mrf.mxu3 }
 0xa31   : > { %1310 = vrot.lane.b32.xlu2 %v1286_v27, %s1981_s29 }
 0xa38   : > { %v1289_v28 = vpop.f32.mrf.mxu3 }
 0xa39   : > { %1312 = vrot.lane.b32.xlu0 %v1289_v28, %s1981_s29 }
 0xa7e   : > { %v1297_v43 = vpop.permute.xlu2 %1296 }
 0xa7f   : > { %v1317_v48 = vsel %vm409_vm9, %v1220_v23, %v1297_v43 }
 0xa8b   : > { %v1311_v49 = vpop.permute.xlu2 %1310 }
 0xa8e   : > { %v1295_v42 = vpop.permute.xlu1 %1294 }
 0xa8f   : > { %v1316_v45 = vsel %vm409_vm9, %v1217_v16, %v1295_v42 }
 0xa94   : > { %v1303_v44 = vpop.permute.xlu0 %1302 }
 0xa95   : > { %v1318_v47 = vsel %vm412_vm10, %v1316_v45, %v1303_v44 }
 0xa96   : > { %v2411_v9 = vsel %vm415_vm11, %v1318_v47, %v1311_v49 }
 0xa9c   : > { %v1305_v46 = vpop.permute.xlu1 %1304 }
 0xa9d   : > { %v1319_v3 = vsel %vm412_vm10, %v1317_v48, %v1305_v46 }
 0xaab   : > { %v1313_v4 = vpop.permute.xlu0 %1312 }
 0xaac   : > { %v2414_v36 = vsel %vm415_vm11, %v1319_v3, %v1313_v4 }
 0xaad   : > { %v1322_v26 = vpack.c.bf16 %v2414_v36, %v2411_v9 }
 0xaaf   : > { %1331 = vmatmul.bf16.vlgmr.msrb.gmra.mxu0 %v1322_v26 }
 0xb2c   : > { %v1332_v29 = vpop.f32.mrf.mxu0 }
 0xb2d   : > { %v1337_v30 = vadd.f32 %v1332_v29, %v2214_v6 }
 0xb2f   : > { %v1740_v31 = vmul.f32 -1.442695, %v1337_v30 }
 0xb31   : > { %1890 = vpow2.f32 %v1740_v31 }
 0xb34   : > { %v1334_v32 = vpop.f32.mrf.mxu0 }
 0xb35   : > { %v1338_v33 = vadd.f32 %v1334_v32, %v2221_v17 }
 0xb37   : > { %v1891_v34 = vpop.eup %1890  ;;  %v1741_v35 = vmul.f32 -1.442695, %v1338_v33 }
 0xb38   : > { %v1345_v39 = vadd.f32 1.0, %v1891_v34 }
 0xb39   : > { %1892 = vpow2.f32 %v1741_v35 }
 0xb3a   : > { %1894 = vrcp.f32 %v1345_v39  ;;  %v1358_v54 = vand.u32 2147483648, %v1345_v39  ;;  %v1356_v6 = vand.u32 2147483647, %v1345_v39  ;;  %vm1352_vm11 = vweird.f32 %v1345_v39 }
 0xb3c   : > { %v1359_v17 = vor.u32 1.1754944e-38, %v1358_v54  ;;  %vm1357_vm7 = vcmp.eq.f32.partialorder %v1356_v6, 8.507059e+37 }
 0xb3f   : > { %v1893_v50 = vpop.eup %1892 }
 0xb40   : > { %v1895_v51 = vpop.eup %1894  ;;  %v1346_v60 = vadd.f32 1.0, %v1893_v50 }
 0xb41   : > { %v1348_v52 = vmul.f32 %v1895_v51, %v1345_v39  ;;  %vm1353_vm0 = vweird.f32 %v1895_v51 }
 0xb42   : > { %1896 = vrcp.f32 %v1346_v60  ;;  %vm1354_vm6 = vmor %vm1352_vm11, %vm1353_vm0  ;;  %v1373_v1 = vand.u32 2147483648, %v1346_v60  ;;  %v1371_v7 = vand.u32 2147483647, %v1346_v60  ;;  %vm1367_vm12 = vweird.f32 %v1346_v60 }
 0xb43   : > { %v1349_v53 = vsub.f32 1.0, %v1348_v52 }
 0xb44   : > { %v1374_v10 = vor.u32 1.1754944e-38, %v1373_v1  ;;  %vm1372_vm14 = vcmp.eq.f32.partialorder %v1371_v7, 8.507059e+37 }
 0xb45   : > { %v1350_v55 = vmul.f32 %v1895_v51, %v1349_v53 }
 0xb47   : > { %v1351_v56 = vadd.f32 %v1895_v51, %v1350_v55 }
 0xb48   : > { %v1897_v57 = vpop.eup %1896 }
 0xb49   : > { %v1363_v58 = vmul.f32 %v1897_v57, %v1346_v60  ;;  %v1355_v61 = vsel %vm1354_vm6, %v1895_v51, %v1351_v56  ;;  %vm1368_vm8 = vweird.f32 %v1897_v57 }
 0xb4a   : > { %v1360_v59 = vsel %vm1357_vm7, %v1359_v17, %v1355_v61  ;;  %vm1369_vm13 = vmor %vm1367_vm12, %vm1368_vm8 }
 0xb4b   : > { %v1364_v62 = vsub.f32 1.0, %v1363_v58  ;;  %v1377_v0 = vmul.f32 %v1360_v59, %v2411_v9 }
 0xb4d   : > { %1407 = vrot.lane.b32.xlu0 %v1377_v0, %s1980_s20  ;;  %1391 = vrot.lane.b32.xlu1 %v1377_v0, %s1981_s29  ;;  %v1365_v5 = vmul.f32 %v1897_v57, %v1364_v62 }
 0xb4f   : > { %v1366_v8 = vadd.f32 %v1897_v57, %v1365_v5 }
 0xb51   : > { %v1370_v11 = vsel %vm1369_vm13, %v1897_v57, %v1366_v8 }
 0xb52   : > { %v1375_v12 = vsel %vm1372_vm14, %v1374_v10, %v1370_v11 }
 0xb53   : > { %v1378_v13 = vmul.f32 %v1375_v12, %v2414_v36 }
 0xb55   : > { %1425 = vrot.lane.b32.xlu0 %v1378_v13, %s1979_s19  ;;  %1409 = vrot.lane.b32.xlu1 %v1378_v13, %s1980_s20 }
 0xb56   : > { %1393 = vrot.lane.b32.xlu2 %v1378_v13, %s1981_s29 }
 0xb5d   : > { %1399 = vrot.lane.b32.xlu0 %v2411_v9, %s1980_s20  ;;  %1381 = vrot.lane.b32.xlu1 %v2411_v9, %s1981_s29 }
 0xb5e   : > { %1423 = vrot.lane.b32.xlu2 %v1377_v0, %s1979_s19 }
 0xb65   : > { %1417 = vrot.lane.b32.xlu0 %v2414_v36, %s1979_s19  ;;  %1401 = vrot.lane.b32.xlu1 %v2414_v36, %s1980_s20 }
 0xb66   : > { %1383 = vrot.lane.b32.xlu2 %v2414_v36, %s1981_s29 }
 0xb6e   : > { %1415 = vrot.lane.b32.xlu2 %v2411_v9, %s1979_s19 }
 0xbb0   : > { %v1394_v38 = vpop.permute.xlu2 %1393 }
 0xbb1   : > { %v1398_v20 = vadd.f32 %v1394_v38, %v1378_v13 }
 0xbb8   : > { %v1424_v2 = vpop.permute.xlu2 %1423 }
 0xbbf   : > { %v1408_v37 = vpop.permute.xlu0 %1407  ;;  %v1392_v14 = vpop.permute.xlu1 %1391 }
 0xbc0   : > { %v1397_v19 = vadd.f32 %v1392_v14, %v1377_v0  ;;  %v1384_v18 = vpop.permute.xlu2 %1383 }
 0xbc1   : > { %v1388_v47 = vadd.f32 %v1384_v18, %v2414_v36 }
 0xbc2   : > { %v1413_v22 = vadd.f32 %v1408_v37, %v1397_v19 }
 0xbc4   : > { %v1429_v21 = vadd.f32 %v1424_v2, %v1413_v22 }
 0xbc7   : > { %v1426_v25 = vpop.permute.xlu0 %1425  ;;  %v1410_v15 = vpop.permute.xlu1 %1409 }
 0xbc8   : > { %v1414_v16 = vadd.f32 %v1410_v15, %v1398_v20  ;;  %v1416_v44 = vpop.permute.xlu2 %1415 }
 0xbca   : > { %v1430_v23 = vadd.f32 %v1426_v25, %v1414_v16 }
 0xbcc   : > { %v1843_v24 = vpack.i.bf16 %v1430_v23, %v1429_v21 }
 0xbce   : > { %1844 = vrot.lane.b32.xlu1 %v1843_v24, %s1979_s19 }
 0xbcf   : > { %v1382_v27 = vpop.permute.xlu1 %1381  ;;  %v1400_v42 = vpop.permute.xlu0 %1399 }
 0xbd0   : > { %v1387_v28 = vadd.f32 %v1382_v27, %v2411_v9 }
 0xbd2   : > { %v1405_v43 = vadd.f32 %v1400_v42, %v1387_v28 }
 0xbd4   : > { %v1421_v45 = vadd.f32 %v1416_v44, %v1405_v43 }
 0xbd6   : > { %1513 = vrot.lane.b32.xlu1 %v1421_v45, %s1979_s19 }
 0xbd7   : > { %v1402_v46 = vpop.permute.xlu1 %1401  ;;  %v1418_v49 = vpop.permute.xlu0 %1417 }
 0xbd8   : > { %v1406_v48 = vadd.f32 %v1402_v46, %v1388_v47 }
 0xbda   : > { %v1422_v4 = vadd.f32 %v1418_v49, %v1406_v48 }
 0xc40   : > { %v1845_v3 = vpop.permute.xlu1 %1844 }
 0xc41   : > { %v1847_v26 = vunpack.i.h.bf16 %v1845_v3  ;;  %v1846_v29 = vunpack.i.l.bf16 %v1845_v3 }
 0xc43   : > { %v1439_v30 = vsel %vm409_vm9, %v1421_v45, %v1846_v29  ;;  %v1440_v31 = vsel %vm409_vm9, %v1422_v4, %v1847_v26 }
 0xc44   : > { %v1441_v9 = vpack.c.bf16 %v1440_v31, %v1439_v30 }
 0xc46   : > { %1742 = vmatmul.msk.bf16.vlgmr.msra.gmra.mxu1 %vm412_vm10, %v1441_v9 }
 0xc48   : > { %v1514_v62 = vpop.permute.xlu1 %1513 }
 0xcc3   : > { %v1454_v32 = vpop.f32.mrf.mxu1 }
 0xcc4   : > { %1461 = vrot.lane.b32.xlu2 %v1454_v32, %s1979_s19 }
 0xccb   : > { %v1456_v33 = vpop.f32.mrf.mxu1 }
 0xccc   : > { %1463 = vrot.lane.b32.xlu0 %v1456_v33, %s1979_s19 }
 0xcd4   : > { %1515 = vrot.lane.b32.xlu0 %v1422_v4, %s1979_s19  ;;  %s257_s19 = sand.u32 1, %s1964_s22  }
 0xcd5   : > { %s1639_s20 = sshll.u32 %s257_s19, 4 }
 0xcd6   : > { %s259_s9 = scalar_lea.vmem [#allocation2], %s1639_s20 }
 0xcd7   : > { %s1558_s14 = sshll.u32 %s259_s9, 4  ;;  %s1559_s14 = int_to_ptr.vmem [resolvable:$true] %s1558_s14 }
 0xd1e   : > { %v1462_v36 = vpop.permute.xlu2 %1461 }
 0xd1f   : > { %v1467_v34 = vadd.f32 %v1462_v36, %v2136_v41 }
 0xd21   : > { %1898 = vtanh.f32 %v1467_v34  ;;  %v1743_v60 = vmul.f32 -1.442695, %v1467_v34 }
 0xd27   : > { %v1899_v35 = vpop.eup %1898 }
 0xd28   : > { %1523 = vrot.lane.b32.xlu2 %v1899_v35, %s1981_s29 }
 0xd3e   : > { %v1464_v39 = vpop.permute.xlu0 %1463 }
 0xd3f   : > { %v1468_v50 = vadd.f32 %v1464_v39, %v2134_v40 }
 0xd41   : > { %1900 = vtanh.f32 %v1468_v50  ;;  %v1744_v8 = vmul.f32 -1.442695, %v1468_v50 }
 0xd42   : > { %1902 = vpow2.f32 %v1743_v60 }
 0xd46   : > { %v1516_v16 = vpop.permute.xlu0 %1515 }
 0xd47   : > { %v1901_v51 = vpop.eup %1900 }
 0xd48   : > { %1525 = vrot.lane.b32.xlu1 %v1901_v51, %s1981_s29  ;;  %v1903_v52 = vpop.eup %1902 }
 0xd49   : > { %v1475_v53 = vadd.f32 1.0, %v1903_v52 }
 0xd4b   : > { %1904 = vrcp.f32 %v1475_v53  ;;  %v1488_v57 = vand.u32 2147483648, %v1475_v53  ;;  %vm1482_vm15 = vweird.f32 %v1475_v53  ;;  %v1486_v17 = vand.u32 2147483647, %v1475_v53 }
 0xd4c   : > { %1906 = vpow2.f32 %v1744_v8 }
 0xd4d   : > { %v1489_v58 = vor.u32 1.1754944e-38, %v1488_v57  ;;  %vm1487_vm2 = vcmp.eq.f32.partialorder %v1486_v17, 8.507059e+37 }
 0xd51   : > { %v1905_v54 = vpop.eup %1904 }
 0xd52   : > { %v1478_v55 = vmul.f32 %v1905_v54, %v1475_v53  ;;  %vm1483_vm10 = vweird.f32 %v1905_v54  ;;  %v1907_v11 = vpop.eup %1906 }
 0xd53   : > { %vm1484_vm1 = vmor %vm1482_vm15, %vm1483_vm10  ;;  %v1476_v12 = vadd.f32 1.0, %v1907_v11 }
 0xd54   : > { %v1479_v6 = vsub.f32 1.0, %v1478_v55 }
 0xd55   : > { %1908 = vrcp.f32 %v1476_v12  ;;  %v1503_v19 = vand.u32 2147483648, %v1476_v12  ;;  %vm1497_vm4 = vweird.f32 %v1476_v12  ;;  %v1501_v20 = vand.u32 2147483647, %v1476_v12 }
 0xd56   : > { %v1480_v41 = vmul.f32 %v1905_v54, %v1479_v6 }
 0xd57   : > { %vm1502_vm0 = vcmp.eq.f32.partialorder %v1501_v20, 8.507059e+37 }
 0xd58   : > { %v1481_v56 = vadd.f32 %v1905_v54, %v1480_v41 }
 0xd5a   : > { %v1485_v40 = vsel %vm1484_vm1, %v1905_v54, %v1481_v56 }
 0xd5b   : > { %v1490_v61 = vsel %vm1487_vm2, %v1489_v58, %v1485_v40  ;;  %v1909_v13 = vpop.eup %1908 }
 0xd5c   : > { %v1509_v59 = vsub.f32 1.0, %v1490_v61  ;;  %v1493_v38 = vmul.f32 %v1909_v13, %v1476_v12  ;;  %vm1498_vm3 = vweird.f32 %v1909_v13 }
 0xd5d   : > { %vm1499_vm5 = vmor %vm1497_vm4, %vm1498_vm3 }
 0xd5e   : > { %v1519_v1 = vmul.f32 %v1514_v62, %v1509_v59  ;;  %v1494_v2 = vsub.f32 1.0, %v1493_v38 }
 0xd60   : > { %v1495_v37 = vmul.f32 %v1909_v13, %v1494_v2 }
 0xd62   : > { %v1496_v14 = vadd.f32 %v1909_v13, %v1495_v37 }
 0xd64   : > { %v1500_v22 = vsel %vm1499_vm5, %v1909_v13, %v1496_v14 }
 0xd82   : > { %v1524_v0 = vpop.permute.xlu2 %1523 }
 0xd83   : > { %v1529_v5 = vmul.f32 %v1524_v0, %v1490_v61 }
 0xd85   : > { %v1531_v7 = vadd.f32 %v1529_v5, %v1519_v1 }
 0xd87   : > { %v1533_v10 = vmul.f32 %v2284_v63, %v1531_v7  ;;  %v1504_v63 = vor.u32 1.1754944e-38, %v1503_v19 }
 0xd89   : > { %1537 = vrot.lane.b32.xlu2 %v1533_v10, %s1981_s29  ;;  %v1505_v25 = vsel %vm1502_vm0, %v1504_v63, %v1500_v22 }
 0xd8a   : > { %v1510_v15 = vsub.f32 1.0, %v1505_v25 }
 0xd8c   : > { %v1520_v21 = vmul.f32 %v1516_v16, %v1510_v15 }
 0xdba   : > { %v1526_v18 = vpop.permute.xlu1 %1525 }
 0xdbb   : > { %v1530_v23 = vmul.f32 %v1526_v18, %v1505_v25 }
 0xdbd   : > { %v1532_v24 = vadd.f32 %v1530_v23, %v1520_v21 }
 0xdbf   : > { %1539 = vrot.lane.b32.xlu0 %v1532_v24, %s1981_s29  ;;  %s1546_s29 = scalar_lea.sflag [#allocation3], %s257_s19 }
 0xde3   : > { %v1538_v27 = vpop.permute.xlu2 %1537 }
 0xde4   : > { %1543 = vst.msk [vmem:[%s259_s9] sm:$0xff] %vm409_vm9, %v1538_v27 }
 0xe31   : > { %v1540_v28 = vpop.permute.xlu0 %1539 }
 0xe32   : > { %1544 = vst.msk [vmem:[%s259_s9 + $0x8] sm:$0xff] %vm409_vm9, %v1540_v28 }
 0xe33   : > { %1937 = shalt.err (!%p1934_p3)
}
 0xe34   : > { %s1982_s19 = smov 128   ;;  %s1983_s9 = smov 8  }
 0xe35   : > { %1767 = dma.vmem_to_hbm [thread:$0]  (%p2057_p5), %s1559_s14, 256, %s1561_s15, %s1546_s29, %s1982_s19, %s1982_s19, %s1983_s9  }
 0xe36 PF: > { %p1773_p4 = scmp.ge.s32.totalorder %s1972_s24, 2  ;;  %s1575_s10 = sand.u32 1, %s1960_s21  }
 0xe37   : > { %s1576_s11 = scalar_lea.sflag [#allocation3], %s1575_s10 }
 0xe38   : > { %p1770_p7 = pnand %p1773_p4, %p2061_p6 }
 0xe3a   : > { %p1771_p8 = pneg %p1770_p7 }
 0xe3c   : > { %1955 = dma.done.wait (%p1771_p8), %s1576_s11, 256  }
 0xe3d   : > { %1957 = vsyncadd (%p1771_p8), %s1576_s11, 4294967040  ;;  %p16_p9 = scmp.ge.s32.totalorder %s2044_s27, 10   ;;  %s2500_s21 = smov %s1964_s22 }
 0xe3e   : > { %s2501_s22 = smov %s1968_s23  ;;  %s2502_s23 = smov %s2055_s30 }
 0xe3f   : > { %s2503_s24 = smov %s2044_s27  ;;  %18 = sbr.rel (!%p16_p9) target bundleno = 3 (0x3), region = 82 }
 0xe44   :  { %1582 = vsyncpa [#allocation3], 1 }
 0xe45   :  { %1584 = vsyncpa [#allocation3 + $0x1], 1 }

</bundles_post_ra>
